<compile_context>
chip_gen: v7x
topology: tpu7x:2x2x1
jax: 0.10.0
libtpu: 0.0.40
codegen_flags: <defaults>
</compile_context>

<pallas_src>
import functools

import jax
import jax.numpy as jnp
from jax.experimental import pallas as pl
from jax.experimental.pallas import tpu as pltpu


def lstm_model_kernel(x_ref, we_ref, be_ref, wih_ref, whh_ref, b_ref,
                      wo_ref, bo_ref, y_ref):
    """Whole forward pass for batch=1; all intermediates vreg-resident.

    x_ref   : (seq, input_size)            f32
    we_ref  : (input_size, size)           bf16  (embed weight, transposed)
    be_ref  : (1, size)                    f32
    wih_ref : (n_blocks, size, 4*size)     bf16  (fused-gate W_ih^T, order i|f|g|o)
    whh_ref : (n_blocks, size, 4*size)     bf16  (fused-gate W_hh^T)
    b_ref   : (n_blocks, 1, 4*size)        f32   (b_ih + b_hh, fused gates)
    wo_ref  : (size, out_pad)              bf16  (output weight, transposed, lane-padded)
    bo_ref  : (1, out_pad)                 f32
    y_ref   : (seq, out_pad)               f32
    """
    seq = x_ref.shape[0]
    size = be_ref.shape[1]
    n_blocks = wih_ref.shape[0]

    # ---- embed + relu (single MXU matmul, bf16 operands / f32 accumulate) ----
    acts = jax.nn.relu(
        jnp.dot(x_ref[...].astype(jnp.bfloat16), we_ref[...],
                preferred_element_type=jnp.float32)
        + be_ref[...])                                   # (seq, size) f32 value

    # ---- initial hidden / cell state (zeros; carried across blocks, like PyTorch) ----
    h = jnp.zeros((1, size), jnp.float32)
    c = jnp.zeros((1, size), jnp.float32)

    # ---- n_blocks stacked LSTM layers, fully unrolled time loop ----
    for blk in range(n_blocks):                          # static unroll over blocks
        # Hoisted input projection for every timestep and all 4 gates at once:
        #   (seq, size) @ (size, 4*size) + (1, 4*size)   -> one vreg (8 x 128 f32)
        xproj = (jnp.dot(acts.astype(jnp.bfloat16), wih_ref[blk],
                         preferred_element_type=jnp.float32)
                 + b_ref[blk])

        whh_blk = whh_ref[blk]                           # (size, 4*size) bf16, loaded once

        rows = []
        for t in range(seq):                             # static unroll over time
            # one fused recurrent matmul per step -> all gate pre-activations
            gates = (xproj[t:t + 1, :]
                     + jnp.dot(h.astype(jnp.bfloat16), whh_blk,
                               preferred_element_type=jnp.float32))
            # two full-vreg EUP passes; static lane slices pick the gates
            sig = jax.nn.sigmoid(gates)
            th = jnp.tanh(gates)
            i_g = sig[:, 0:size]
            f_g = sig[:, size:2 * size]
            g_g = th[:, 2 * size:3 * size]
            o_g = sig[:, 3 * size:4 * size]
            c = f_g * c + i_g * g_g
            h = o_g * jnp.tanh(c)
            rows.append(h)

        acts = jnp.concatenate(rows, axis=0)             # (seq, size) next layer's input

    # ---- output linear + sigmoid (lane-dense, padded to out_pad lanes) ----
    y_ref[...] = jax.nn.sigmoid(
        jnp.dot(acts.astype(jnp.bfloat16), wo_ref[...],
                preferred_element_type=jnp.float32)
        + bo_ref[...])


@functools.partial(jax.jit, static_argnames=("target_size",))
def model_forward(x, we, be, wih_t, whh_t, b, wo_pad, bo_pad, *, target_size):
    seq = x.shape[0]
    out_pad = wo_pad.shape[1]
    y_full = pl.pallas_call(
        lstm_model_kernel,
        out_shape=jax.ShapeDtypeStruct((seq, out_pad), jnp.float32),
        in_specs=[pl.BlockSpec(memory_space=pltpu.MemorySpace.VMEM)] * 8,
        out_specs=pl.BlockSpec(memory_space=pltpu.MemorySpace.VMEM),
    )(x, we, be, wih_t, whh_t, b, wo_pad, bo_pad)
    return y_full[:, :target_size]


def ref_forward(x, We, be, Wih, Whh, bih, bhh, Wo, bo, size, n_blocks):
    """Pure-JAX f32 reference mirroring the PyTorch forward (batch=1)."""
    seq = x.shape[0]
    xx = jax.nn.relu(x @ We.T + be)
    h = jnp.zeros((1, size), jnp.float32)
    c = jnp.zeros((1, size), jnp.float32)
    for blk in range(n_blocks):
        outs = []
        for t in range(seq):
            xt = xx[t:t + 1]
            gates = xt @ Wih[blk].T + h @ Whh[blk].T + bih[blk][None, :] + bhh[blk][None, :]
            i_g, f_g, g_g, o_g = jnp.split(gates, 4, axis=1)
            i_g = jax.nn.sigmoid(i_g)
            f_g = jax.nn.sigmoid(f_g)
            g_g = jnp.tanh(g_g)
            o_g = jax.nn.sigmoid(o_g)
            c = f_g * c + i_g * g_g
            h = o_g * jnp.tanh(c)
            outs.append(h)
        xx = jnp.concatenate(outs, axis=0)
    return jax.nn.sigmoid(xx @ Wo.T + bo)


if __name__ == "__main__":
    # Small shapes consistent with the module.
    input_size, size, target_size = 16, 32, 4
    n_blocks, seq = 2, 8
    LANE = 128
    out_pad = ((target_size + LANE - 1) // LANE) * LANE

    key = jax.random.PRNGKey(0)
    ks = jax.random.split(key, 12)
    scale = 1.0 / jnp.sqrt(size)

    # Deterministic synthetic parameters (PyTorch-style shapes).
    We = jax.random.uniform(ks[0], (size, input_size), jnp.float32, -scale, scale)
    be = jax.random.uniform(ks[1], (size,), jnp.float32, -scale, scale)
    Wih = jax.random.uniform(ks[2], (n_blocks, 4 * size, size), jnp.float32, -scale, scale)
    Whh = jax.random.uniform(ks[3], (n_blocks, 4 * size, size), jnp.float32, -scale, scale)
    bih = jax.random.uniform(ks[4], (n_blocks, 4 * size), jnp.float32, -scale, scale)
    bhh = jax.random.uniform(ks[5], (n_blocks, 4 * size), jnp.float32, -scale, scale)
    Wo = jax.random.uniform(ks[6], (target_size, size), jnp.float32, -scale, scale)
    bo = jax.random.uniform(ks[7], (target_size,), jnp.float32, -scale, scale)

    # Input: (seq, batch=1, input_size) in PyTorch; batch squeezed here.
    x = jax.random.normal(ks[8], (seq, input_size), jnp.float32)

    # Repack weights for the kernel:
    #  * transposed so out-features map to lanes,
    #  * the 4 gates fused along the lane axis in PyTorch order i|f|g|o,
    #  * biases pre-summed and kept f32,
    #  * output weight/bias zero-padded to a 128-wide lane-dense last dim,
    #  * matmul weights cast to bf16 (f32 accumulation inside the kernel).
    we_k = We.T.astype(jnp.bfloat16)                                   # (input, size)
    be_k = be[None, :]                                                 # (1, size) f32
    wih_k = Wih.transpose(0, 2, 1).astype(jnp.bfloat16)                # (nb, size, 4*size)
    whh_k = Whh.transpose(0, 2, 1).astype(jnp.bfloat16)                # (nb, size, 4*size)
    b_k = (bih + bhh).reshape(n_blocks, 1, 4 * size)                   # (nb, 1, 4*size) f32
    wo_k = (jnp.zeros((size, out_pad), jnp.float32)
            .at[:, :target_size].set(Wo.T)).astype(jnp.bfloat16)       # (size, out_pad)
    bo_k = jnp.zeros((1, out_pad), jnp.float32).at[:, :target_size].set(bo[None, :])

    y = model_forward(x, we_k, be_k, wih_k, whh_k, b_k, wo_k, bo_k,
                      target_size=target_size)
    y = jax.block_until_ready(y)

    y_ref = ref_forward(x, We, be, Wih, Whh, bih, bhh, Wo, bo, size, n_blocks)
    y_ref = jax.block_until_ready(y_ref)

    assert y.shape == (seq, target_size)
    # bf16 matmul operands with f32 accumulation vs. the pure-f32 reference.
    assert jnp.allclose(y, y_ref, rtol=2e-2, atol=2e-2), float(jnp.max(jnp.abs(y - y_ref)))

    print("KERNEL_OK")
</pallas_src>

<mosaic_0001>
module attributes {stable_mosaic.version = 11 : i64} {
  func.func @lstm_model_kernel(%arg0: memref<8x16xf32, #tpu.memory_space<vmem>>, %arg1: memref<16x32xbf16, #tpu.memory_space<vmem>>, %arg2: memref<1x32xf32, #tpu.memory_space<vmem>>, %arg3: memref<2x32x128xbf16, #tpu.memory_space<vmem>>, %arg4: memref<2x32x128xbf16, #tpu.memory_space<vmem>>, %arg5: memref<2x1x128xf32, #tpu.memory_space<vmem>>, %arg6: memref<32x128xbf16, #tpu.memory_space<vmem>>, %arg7: memref<1x128xf32, #tpu.memory_space<vmem>>, %arg8: memref<8x128xf32, #tpu.memory_space<vmem>>) attributes {dimension_semantics = [], scalar_prefetch = 0 : i64, scratch_operands = 0 : i64, tpu.core_type = #tpu.core_type<tc>} {
    %c0 = arith.constant 0 : index
    %c0_0 = arith.constant 0 : index
    %0 = vector.load %arg0[%c0, %c0_0] : memref<8x16xf32, #tpu.memory_space<vmem>>, vector<8x16xf32>
    %1 = arith.truncf %0 : vector<8x16xf32> to vector<8x16xbf16>
    %c0_1 = arith.constant 0 : index
    %c0_2 = arith.constant 0 : index
    %2 = vector.load %arg1[%c0_1, %c0_2] : memref<16x32xbf16, #tpu.memory_space<vmem>>, vector<16x32xbf16>
    %cst = arith.constant dense<0.000000e+00> : vector<8x32xf32>
    %3 = tpu.matmul %1, %2, %cst {dimension_numbers = #tpu.dot_dimension_numbers<[1], [0], [0], [1], [0, 0, 1, 1], [], []>} : vector<8x16xbf16>, vector<16x32xbf16>, vector<8x32xf32> -> vector<8x32xf32>
    %c0_3 = arith.constant 0 : index
    %c0_4 = arith.constant 0 : index
    %4 = vector.load %arg2[%c0_3, %c0_4] : memref<1x32xf32, #tpu.memory_space<vmem>>, vector<1x32xf32>
    %5 = vector.broadcast %4 : vector<1x32xf32> to vector<8x32xf32>
    %6 = arith.addf %3, %5 : vector<8x32xf32>
    %cst_5 = arith.constant 0.000000e+00 : f32
    %7 = vector.broadcast %cst_5 : f32 to vector<8x32xf32>
    %8 = arith.maximumf %6, %7 : vector<8x32xf32>
    %cst_6 = arith.constant 0.000000e+00 : f32
    %9 = vector.broadcast %cst_6 : f32 to vector<1x32xf32>
    %cst_7 = arith.constant 0.000000e+00 : f32
    %10 = vector.broadcast %cst_7 : f32 to vector<1x32xf32>
    %11 = arith.truncf %8 : vector<8x32xf32> to vector<8x32xbf16>
    %c0_8 = arith.constant 0 : index
    %c0_9 = arith.constant 0 : index
    %c0_10 = arith.constant 0 : index
    %12 = vector.load %arg3[%c0_8, %c0_9, %c0_10] : memref<2x32x128xbf16, #tpu.memory_space<vmem>>, vector<1x32x128xbf16>
    %13 = vector.shape_cast %12 : vector<1x32x128xbf16> to vector<32x128xbf16>
    %cst_11 = arith.constant dense<0.000000e+00> : vector<8x128xf32>
    %14 = tpu.matmul %11, %13, %cst_11 {dimension_numbers = #tpu.dot_dimension_numbers<[1], [0], [0], [1], [0, 0, 1, 1], [], []>} : vector<8x32xbf16>, vector<32x128xbf16>, vector<8x128xf32> -> vector<8x128xf32>
    %c0_12 = arith.constant 0 : index
    %c0_13 = arith.constant 0 : index
    %c0_14 = arith.constant 0 : index
    %15 = vector.load %arg5[%c0_12, %c0_13, %c0_14] : memref<2x1x128xf32, #tpu.memory_space<vmem>>, vector<1x1x128xf32>
    %16 = vector.shape_cast %15 : vector<1x1x128xf32> to vector<1x128xf32>
    %17 = vector.broadcast %16 : vector<1x128xf32> to vector<8x128xf32>
    %18 = arith.addf %14, %17 : vector<8x128xf32>
    %c0_15 = arith.constant 0 : index
    %c0_16 = arith.constant 0 : index
    %c0_17 = arith.constant 0 : index
    %19 = vector.load %arg4[%c0_15, %c0_16, %c0_17] : memref<2x32x128xbf16, #tpu.memory_space<vmem>>, vector<1x32x128xbf16>
    %20 = vector.shape_cast %19 : vector<1x32x128xbf16> to vector<32x128xbf16>
    %21 = vector.extract_strided_slice %18 {offsets = [0, 0], sizes = [1, 128], strides = [1, 1]} : vector<8x128xf32> to vector<1x128xf32>
    %22 = arith.truncf %9 : vector<1x32xf32> to vector<1x32xbf16>
    %cst_18 = arith.constant dense<0.000000e+00> : vector<1x128xf32>
    %23 = tpu.matmul %22, %20, %cst_18 {dimension_numbers = #tpu.dot_dimension_numbers<[1], [0], [0], [1], [0, 0, 1, 1], [], []>} : vector<1x32xbf16>, vector<32x128xbf16>, vector<1x128xf32> -> vector<1x128xf32>
    %24 = arith.addf %21, %23 : vector<1x128xf32>
    %25 = arith.negf %24 : vector<1x128xf32>
    %26 = math.exp %25 : vector<1x128xf32>
    %cst_19 = arith.constant 1.000000e+00 : f32
    %27 = vector.broadcast %cst_19 : f32 to vector<1x128xf32>
    %28 = arith.addf %27, %26 : vector<1x128xf32>
    %29 = arith.divf %27, %28 : vector<1x128xf32>
    %30 = math.tanh %24 : vector<1x128xf32>
    %31 = vector.extract_strided_slice %29 {offsets = [0, 0], sizes = [1, 32], strides = [1, 1]} : vector<1x128xf32> to vector<1x32xf32>
    %32 = vector.extract_strided_slice %29 {offsets = [0, 32], sizes = [1, 32], strides = [1, 1]} : vector<1x128xf32> to vector<1x32xf32>
    %33 = vector.extract_strided_slice %30 {offsets = [0, 64], sizes = [1, 32], strides = [1, 1]} : vector<1x128xf32> to vector<1x32xf32>
    %34 = vector.extract_strided_slice %29 {offsets = [0, 96], sizes = [1, 32], strides = [1, 1]} : vector<1x128xf32> to vector<1x32xf32>
    %35 = arith.mulf %32, %10 : vector<1x32xf32>
    %36 = arith.mulf %31, %33 : vector<1x32xf32>
    %37 = arith.addf %35, %36 : vector<1x32xf32>
    %38 = math.tanh %37 : vector<1x32xf32>
    %39 = arith.mulf %34, %38 : vector<1x32xf32>
    %40 = vector.extract_strided_slice %18 {offsets = [1, 0], sizes = [1, 128], strides = [1, 1]} : vector<8x128xf32> to vector<1x128xf32>
    %41 = arith.truncf %39 : vector<1x32xf32> to vector<1x32xbf16>
    %cst_20 = arith.constant dense<0.000000e+00> : vector<1x128xf32>
    %42 = tpu.matmul %41, %20, %cst_20 {dimension_numbers = #tpu.dot_dimension_numbers<[1], [0], [0], [1], [0, 0, 1, 1], [], []>} : vector<1x32xbf16>, vector<32x128xbf16>, vector<1x128xf32> -> vector<1x128xf32>
    %43 = arith.addf %40, %42 : vector<1x128xf32>
    %44 = arith.negf %43 : vector<1x128xf32>
    %45 = math.exp %44 : vector<1x128xf32>
    %cst_21 = arith.constant 1.000000e+00 : f32
    %46 = vector.broadcast %cst_21 : f32 to vector<1x128xf32>
    %47 = arith.addf %46, %45 : vector<1x128xf32>
    %48 = arith.divf %46, %47 : vector<1x128xf32>
    %49 = math.tanh %43 : vector<1x128xf32>
    %50 = vector.extract_strided_slice %48 {offsets = [0, 0], sizes = [1, 32], strides = [1, 1]} : vector<1x128xf32> to vector<1x32xf32>
    %51 = vector.extract_strided_slice %48 {offsets = [0, 32], sizes = [1, 32], strides = [1, 1]} : vector<1x128xf32> to vector<1x32xf32>
    %52 = vector.extract_strided_slice %49 {offsets = [0, 64], sizes = [1, 32], strides = [1, 1]} : vector<1x128xf32> to vector<1x32xf32>
    %53 = vector.extract_strided_slice %48 {offsets = [0, 96], sizes = [1, 32], strides = [1, 1]} : vector<1x128xf32> to vector<1x32xf32>
    %54 = arith.mulf %51, %37 : vector<1x32xf32>
    %55 = arith.mulf %50, %52 : vector<1x32xf32>
    %56 = arith.addf %54, %55 : vector<1x32xf32>
    %57 = math.tanh %56 : vector<1x32xf32>
    %58 = arith.mulf %53, %57 : vector<1x32xf32>
    %59 = vector.extract_strided_slice %18 {offsets = [2, 0], sizes = [1, 128], strides = [1, 1]} : vector<8x128xf32> to vector<1x128xf32>
    %60 = arith.truncf %58 : vector<1x32xf32> to vector<1x32xbf16>
    %cst_22 = arith.constant dense<0.000000e+00> : vector<1x128xf32>
    %61 = tpu.matmul %60, %20, %cst_22 {dimension_numbers = #tpu.dot_dimension_numbers<[1], [0], [0], [1], [0, 0, 1, 1], [], []>} : vector<1x32xbf16>, vector<32x128xbf16>, vector<1x128xf32> -> vector<1x128xf32>
    %62 = arith.addf %59, %61 : vector<1x128xf32>
    %63 = arith.negf %62 : vector<1x128xf32>
    %64 = math.exp %63 : vector<1x128xf32>
    %cst_23 = arith.constant 1.000000e+00 : f32
    %65 = vector.broadcast %cst_23 : f32 to vector<1x128xf32>
    %66 = arith.addf %65, %64 : vector<1x128xf32>
    %67 = arith.divf %65, %66 : vector<1x128xf32>
    %68 = math.tanh %62 : vector<1x128xf32>
    %69 = vector.extract_strided_slice %67 {offsets = [0, 0], sizes = [1, 32], strides = [1, 1]} : vector<1x128xf32> to vector<1x32xf32>
    %70 = vector.extract_strided_slice %67 {offsets = [0, 32], sizes = [1, 32], strides = [1, 1]} : vector<1x128xf32> to vector<1x32xf32>
    %71 = vector.extract_strided_slice %68 {offsets = [0, 64], sizes = [1, 32], strides = [1, 1]} : vector<1x128xf32> to vector<1x32xf32>
    %72 = vector.extract_strided_slice %67 {offsets = [0, 96], sizes = [1, 32], strides = [1, 1]} : vector<1x128xf32> to vector<1x32xf32>
    %73 = arith.mulf %70, %56 : vector<1x32xf32>
    %74 = arith.mulf %69, %71 : vector<1x32xf32>
    %75 = arith.addf %73, %74 : vector<1x32xf32>
    %76 = math.tanh %75 : vector<1x32xf32>
    %77 = arith.mulf %72, %76 : vector<1x32xf32>
    %78 = vector.extract_strided_slice %18 {offsets = [3, 0], sizes = [1, 128], strides = [1, 1]} : vector<8x128xf32> to vector<1x128xf32>
    %79 = arith.truncf %77 : vector<1x32xf32> to vector<1x32xbf16>
    %cst_24 = arith.constant dense<0.000000e+00> : vector<1x128xf32>
    %80 = tpu.matmul %79, %20, %cst_24 {dimension_numbers = #tpu.dot_dimension_numbers<[1], [0], [0], [1], [0, 0, 1, 1], [], []>} : vector<1x32xbf16>, vector<32x128xbf16>, vector<1x128xf32> -> vector<1x128xf32>
    %81 = arith.addf %78, %80 : vector<1x128xf32>
    %82 = arith.negf %81 : vector<1x128xf32>
    %83 = math.exp %82 : vector<1x128xf32>
    %cst_25 = arith.constant 1.000000e+00 : f32
    %84 = vector.broadcast %cst_25 : f32 to vector<1x128xf32>
    %85 = arith.addf %84, %83 : vector<1x128xf32>
    %86 = arith.divf %84, %85 : vector<1x128xf32>
    %87 = math.tanh %81 : vector<1x128xf32>
    %88 = vector.extract_strided_slice %86 {offsets = [0, 0], sizes = [1, 32], strides = [1, 1]} : vector<1x128xf32> to vector<1x32xf32>
    %89 = vector.extract_strided_slice %86 {offsets = [0, 32], sizes = [1, 32], strides = [1, 1]} : vector<1x128xf32> to vector<1x32xf32>
    %90 = vector.extract_strided_slice %87 {offsets = [0, 64], sizes = [1, 32], strides = [1, 1]} : vector<1x128xf32> to vector<1x32xf32>
    %91 = vector.extract_strided_slice %86 {offsets = [0, 96], sizes = [1, 32], strides = [1, 1]} : vector<1x128xf32> to vector<1x32xf32>
    %92 = arith.mulf %89, %75 : vector<1x32xf32>
    %93 = arith.mulf %88, %90 : vector<1x32xf32>
    %94 = arith.addf %92, %93 : vector<1x32xf32>
    %95 = math.tanh %94 : vector<1x32xf32>
    %96 = arith.mulf %91, %95 : vector<1x32xf32>
    %97 = vector.extract_strided_slice %18 {offsets = [4, 0], sizes = [1, 128], strides = [1, 1]} : vector<8x128xf32> to vector<1x128xf32>
    %98 = arith.truncf %96 : vector<1x32xf32> to vector<1x32xbf16>
    %cst_26 = arith.constant dense<0.000000e+00> : vector<1x128xf32>
    %99 = tpu.matmul %98, %20, %cst_26 {dimension_numbers = #tpu.dot_dimension_numbers<[1], [0], [0], [1], [0, 0, 1, 1], [], []>} : vector<1x32xbf16>, vector<32x128xbf16>, vector<1x128xf32> -> vector<1x128xf32>
    %100 = arith.addf %97, %99 : vector<1x128xf32>
    %101 = arith.negf %100 : vector<1x128xf32>
    %102 = math.exp %101 : vector<1x128xf32>
    %cst_27 = arith.constant 1.000000e+00 : f32
    %103 = vector.broadcast %cst_27 : f32 to vector<1x128xf32>
    %104 = arith.addf %103, %102 : vector<1x128xf32>
    %105 = arith.divf %103, %104 : vector<1x128xf32>
    %106 = math.tanh %100 : vector<1x128xf32>
    %107 = vector.extract_strided_slice %105 {offsets = [0, 0], sizes = [1, 32], strides = [1, 1]} : vector<1x128xf32> to vector<1x32xf32>
    %108 = vector.extract_strided_slice %105 {offsets = [0, 32], sizes = [1, 32], strides = [1, 1]} : vector<1x128xf32> to vector<1x32xf32>
    %109 = vector.extract_strided_slice %106 {offsets = [0, 64], sizes = [1, 32], strides = [1, 1]} : vector<1x128xf32> to vector<1x32xf32>
    %110 = vector.extract_strided_slice %105 {offsets = [0, 96], sizes = [1, 32], strides = [1, 1]} : vector<1x128xf32> to vector<1x32xf32>
    %111 = arith.mulf %108, %94 : vector<1x32xf32>
    %112 = arith.mulf %107, %109 : vector<1x32xf32>
    %113 = arith.addf %111, %112 : vector<1x32xf32>
    %114 = math.tanh %113 : vector<1x32xf32>
    %115 = arith.mulf %110, %114 : vector<1x32xf32>
    %116 = vector.extract_strided_slice %18 {offsets = [5, 0], sizes = [1, 128], strides = [1, 1]} : vector<8x128xf32> to vector<1x128xf32>
    %117 = arith.truncf %115 : vector<1x32xf32> to vector<1x32xbf16>
    %cst_28 = arith.constant dense<0.000000e+00> : vector<1x128xf32>
    %118 = tpu.matmul %117, %20, %cst_28 {dimension_numbers = #tpu.dot_dimension_numbers<[1], [0], [0], [1], [0, 0, 1, 1], [], []>} : vector<1x32xbf16>, vector<32x128xbf16>, vector<1x128xf32> -> vector<1x128xf32>
    %119 = arith.addf %116, %118 : vector<1x128xf32>
    %120 = arith.negf %119 : vector<1x128xf32>
    %121 = math.exp %120 : vector<1x128xf32>
    %cst_29 = arith.constant 1.000000e+00 : f32
    %122 = vector.broadcast %cst_29 : f32 to vector<1x128xf32>
    %123 = arith.addf %122, %121 : vector<1x128xf32>
    %124 = arith.divf %122, %123 : vector<1x128xf32>
    %125 = math.tanh %119 : vector<1x128xf32>
    %126 = vector.extract_strided_slice %124 {offsets = [0, 0], sizes = [1, 32], strides = [1, 1]} : vector<1x128xf32> to vector<1x32xf32>
    %127 = vector.extract_strided_slice %124 {offsets = [0, 32], sizes = [1, 32], strides = [1, 1]} : vector<1x128xf32> to vector<1x32xf32>
    %128 = vector.extract_strided_slice %125 {offsets = [0, 64], sizes = [1, 32], strides = [1, 1]} : vector<1x128xf32> to vector<1x32xf32>
    %129 = vector.extract_strided_slice %124 {offsets = [0, 96], sizes = [1, 32], strides = [1, 1]} : vector<1x128xf32> to vector<1x32xf32>
    %130 = arith.mulf %127, %113 : vector<1x32xf32>
    %131 = arith.mulf %126, %128 : vector<1x32xf32>
    %132 = arith.addf %130, %131 : vector<1x32xf32>
    %133 = math.tanh %132 : vector<1x32xf32>
    %134 = arith.mulf %129, %133 : vector<1x32xf32>
    %135 = vector.extract_strided_slice %18 {offsets = [6, 0], sizes = [1, 128], strides = [1, 1]} : vector<8x128xf32> to vector<1x128xf32>
    %136 = arith.truncf %134 : vector<1x32xf32> to vector<1x32xbf16>
    %cst_30 = arith.constant dense<0.000000e+00> : vector<1x128xf32>
    %137 = tpu.matmul %136, %20, %cst_30 {dimension_numbers = #tpu.dot_dimension_numbers<[1], [0], [0], [1], [0, 0, 1, 1], [], []>} : vector<1x32xbf16>, vector<32x128xbf16>, vector<1x128xf32> -> vector<1x128xf32>
    %138 = arith.addf %135, %137 : vector<1x128xf32>
    %139 = arith.negf %138 : vector<1x128xf32>
    %140 = math.exp %139 : vector<1x128xf32>
    %cst_31 = arith.constant 1.000000e+00 : f32
    %141 = vector.broadcast %cst_31 : f32 to vector<1x128xf32>
    %142 = arith.addf %141, %140 : vector<1x128xf32>
    %143 = arith.divf %141, %142 : vector<1x128xf32>
    %144 = math.tanh %138 : vector<1x128xf32>
    %145 = vector.extract_strided_slice %143 {offsets = [0, 0], sizes = [1, 32], strides = [1, 1]} : vector<1x128xf32> to vector<1x32xf32>
    %146 = vector.extract_strided_slice %143 {offsets = [0, 32], sizes = [1, 32], strides = [1, 1]} : vector<1x128xf32> to vector<1x32xf32>
    %147 = vector.extract_strided_slice %144 {offsets = [0, 64], sizes = [1, 32], strides = [1, 1]} : vector<1x128xf32> to vector<1x32xf32>
    %148 = vector.extract_strided_slice %143 {offsets = [0, 96], sizes = [1, 32], strides = [1, 1]} : vector<1x128xf32> to vector<1x32xf32>
    %149 = arith.mulf %146, %132 : vector<1x32xf32>
    %150 = arith.mulf %145, %147 : vector<1x32xf32>
    %151 = arith.addf %149, %150 : vector<1x32xf32>
    %152 = math.tanh %151 : vector<1x32xf32>
    %153 = arith.mulf %148, %152 : vector<1x32xf32>
    %154 = vector.extract_strided_slice %18 {offsets = [7, 0], sizes = [1, 128], strides = [1, 1]} : vector<8x128xf32> to vector<1x128xf32>
    %155 = arith.truncf %153 : vector<1x32xf32> to vector<1x32xbf16>
    %cst_32 = arith.constant dense<0.000000e+00> : vector<1x128xf32>
    %156 = tpu.matmul %155, %20, %cst_32 {dimension_numbers = #tpu.dot_dimension_numbers<[1], [0], [0], [1], [0, 0, 1, 1], [], []>} : vector<1x32xbf16>, vector<32x128xbf16>, vector<1x128xf32> -> vector<1x128xf32>
    %157 = arith.addf %154, %156 : vector<1x128xf32>
    %158 = arith.negf %157 : vector<1x128xf32>
    %159 = math.exp %158 : vector<1x128xf32>
    %cst_33 = arith.constant 1.000000e+00 : f32
    %160 = vector.broadcast %cst_33 : f32 to vector<1x128xf32>
    %161 = arith.addf %160, %159 : vector<1x128xf32>
    %162 = arith.divf %160, %161 : vector<1x128xf32>
    %163 = math.tanh %157 : vector<1x128xf32>
    %164 = vector.extract_strided_slice %162 {offsets = [0, 0], sizes = [1, 32], strides = [1, 1]} : vector<1x128xf32> to vector<1x32xf32>
    %165 = vector.extract_strided_slice %162 {offsets = [0, 32], sizes = [1, 32], strides = [1, 1]} : vector<1x128xf32> to vector<1x32xf32>
    %166 = vector.extract_strided_slice %163 {offsets = [0, 64], sizes = [1, 32], strides = [1, 1]} : vector<1x128xf32> to vector<1x32xf32>
    %167 = vector.extract_strided_slice %162 {offsets = [0, 96], sizes = [1, 32], strides = [1, 1]} : vector<1x128xf32> to vector<1x32xf32>
    %168 = arith.mulf %165, %151 : vector<1x32xf32>
    %169 = arith.mulf %164, %166 : vector<1x32xf32>
    %170 = arith.addf %168, %169 : vector<1x32xf32>
    %171 = math.tanh %170 : vector<1x32xf32>
    %172 = arith.mulf %167, %171 : vector<1x32xf32>
    %173 = tpu.concatenate %39, %58, %77, %96, %115, %134, %153, %172 in 0 : vector<1x32xf32>, vector<1x32xf32>, vector<1x32xf32>, vector<1x32xf32>, vector<1x32xf32>, vector<1x32xf32>, vector<1x32xf32>, vector<1x32xf32> -> vector<8x32xf32>
    %174 = arith.truncf %173 : vector<8x32xf32> to vector<8x32xbf16>
    %c1 = arith.constant 1 : index
    %c0_34 = arith.constant 0 : index
    %c0_35 = arith.constant 0 : index
    %175 = vector.load %arg3[%c1, %c0_34, %c0_35] : memref<2x32x128xbf16, #tpu.memory_space<vmem>>, vector<1x32x128xbf16>
    %176 = vector.shape_cast %175 : vector<1x32x128xbf16> to vector<32x128xbf16>
    %cst_36 = arith.constant dense<0.000000e+00> : vector<8x128xf32>
    %177 = tpu.matmul %174, %176, %cst_36 {dimension_numbers = #tpu.dot_dimension_numbers<[1], [0], [0], [1], [0, 0, 1, 1], [], []>} : vector<8x32xbf16>, vector<32x128xbf16>, vector<8x128xf32> -> vector<8x128xf32>
    %c1_37 = arith.constant 1 : index
    %c0_38 = arith.constant 0 : index
    %c0_39 = arith.constant 0 : index
    %178 = vector.load %arg5[%c1_37, %c0_38, %c0_39] : memref<2x1x128xf32, #tpu.memory_space<vmem>>, vector<1x1x128xf32>
    %179 = vector.shape_cast %178 : vector<1x1x128xf32> to vector<1x128xf32>
    %180 = vector.broadcast %179 : vector<1x128xf32> to vector<8x128xf32>
    %181 = arith.addf %177, %180 : vector<8x128xf32>
    %c1_40 = arith.constant 1 : index
    %c0_41 = arith.constant 0 : index
    %c0_42 = arith.constant 0 : index
    %182 = vector.load %arg4[%c1_40, %c0_41, %c0_42] : memref<2x32x128xbf16, #tpu.memory_space<vmem>>, vector<1x32x128xbf16>
    %183 = vector.shape_cast %182 : vector<1x32x128xbf16> to vector<32x128xbf16>
    %184 = vector.extract_strided_slice %181 {offsets = [0, 0], sizes = [1, 128], strides = [1, 1]} : vector<8x128xf32> to vector<1x128xf32>
    %185 = arith.truncf %172 : vector<1x32xf32> to vector<1x32xbf16>
    %cst_43 = arith.constant dense<0.000000e+00> : vector<1x128xf32>
    %186 = tpu.matmul %185, %183, %cst_43 {dimension_numbers = #tpu.dot_dimension_numbers<[1], [0], [0], [1], [0, 0, 1, 1], [], []>} : vector<1x32xbf16>, vector<32x128xbf16>, vector<1x128xf32> -> vector<1x128xf32>
    %187 = arith.addf %184, %186 : vector<1x128xf32>
    %188 = arith.negf %187 : vector<1x128xf32>
    %189 = math.exp %188 : vector<1x128xf32>
    %cst_44 = arith.constant 1.000000e+00 : f32
    %190 = vector.broadcast %cst_44 : f32 to vector<1x128xf32>
    %191 = arith.addf %190, %189 : vector<1x128xf32>
    %192 = arith.divf %190, %191 : vector<1x128xf32>
    %193 = math.tanh %187 : vector<1x128xf32>
    %194 = vector.extract_strided_slice %192 {offsets = [0, 0], sizes = [1, 32], strides = [1, 1]} : vector<1x128xf32> to vector<1x32xf32>
    %195 = vector.extract_strided_slice %192 {offsets = [0, 32], sizes = [1, 32], strides = [1, 1]} : vector<1x128xf32> to vector<1x32xf32>
    %196 = vector.extract_strided_slice %193 {offsets = [0, 64], sizes = [1, 32], strides = [1, 1]} : vector<1x128xf32> to vector<1x32xf32>
    %197 = vector.extract_strided_slice %192 {offsets = [0, 96], sizes = [1, 32], strides = [1, 1]} : vector<1x128xf32> to vector<1x32xf32>
    %198 = arith.mulf %195, %170 : vector<1x32xf32>
    %199 = arith.mulf %194, %196 : vector<1x32xf32>
    %200 = arith.addf %198, %199 : vector<1x32xf32>
    %201 = math.tanh %200 : vector<1x32xf32>
    %202 = arith.mulf %197, %201 : vector<1x32xf32>
    %203 = vector.extract_strided_slice %181 {offsets = [1, 0], sizes = [1, 128], strides = [1, 1]} : vector<8x128xf32> to vector<1x128xf32>
    %204 = arith.truncf %202 : vector<1x32xf32> to vector<1x32xbf16>
    %cst_45 = arith.constant dense<0.000000e+00> : vector<1x128xf32>
    %205 = tpu.matmul %204, %183, %cst_45 {dimension_numbers = #tpu.dot_dimension_numbers<[1], [0], [0], [1], [0, 0, 1, 1], [], []>} : vector<1x32xbf16>, vector<32x128xbf16>, vector<1x128xf32> -> vector<1x128xf32>
    %206 = arith.addf %203, %205 : vector<1x128xf32>
    %207 = arith.negf %206 : vector<1x128xf32>
    %208 = math.exp %207 : vector<1x128xf32>
    %cst_46 = arith.constant 1.000000e+00 : f32
    %209 = vector.broadcast %cst_46 : f32 to vector<1x128xf32>
    %210 = arith.addf %209, %208 : vector<1x128xf32>
    %211 = arith.divf %209, %210 : vector<1x128xf32>
    %212 = math.tanh %206 : vector<1x128xf32>
    %213 = vector.extract_strided_slice %211 {offsets = [0, 0], sizes = [1, 32], strides = [1, 1]} : vector<1x128xf32> to vector<1x32xf32>
    %214 = vector.extract_strided_slice %211 {offsets = [0, 32], sizes = [1, 32], strides = [1, 1]} : vector<1x128xf32> to vector<1x32xf32>
    %215 = vector.extract_strided_slice %212 {offsets = [0, 64], sizes = [1, 32], strides = [1, 1]} : vector<1x128xf32> to vector<1x32xf32>
    %216 = vector.extract_strided_slice %211 {offsets = [0, 96], sizes = [1, 32], strides = [1, 1]} : vector<1x128xf32> to vector<1x32xf32>
    %217 = arith.mulf %214, %200 : vector<1x32xf32>
    %218 = arith.mulf %213, %215 : vector<1x32xf32>
    %219 = arith.addf %217, %218 : vector<1x32xf32>
    %220 = math.tanh %219 : vector<1x32xf32>
    %221 = arith.mulf %216, %220 : vector<1x32xf32>
    %222 = vector.extract_strided_slice %181 {offsets = [2, 0], sizes = [1, 128], strides = [1, 1]} : vector<8x128xf32> to vector<1x128xf32>
    %223 = arith.truncf %221 : vector<1x32xf32> to vector<1x32xbf16>
    %cst_47 = arith.constant dense<0.000000e+00> : vector<1x128xf32>
    %224 = tpu.matmul %223, %183, %cst_47 {dimension_numbers = #tpu.dot_dimension_numbers<[1], [0], [0], [1], [0, 0, 1, 1], [], []>} : vector<1x32xbf16>, vector<32x128xbf16>, vector<1x128xf32> -> vector<1x128xf32>
    %225 = arith.addf %222, %224 : vector<1x128xf32>
    %226 = arith.negf %225 : vector<1x128xf32>
    %227 = math.exp %226 : vector<1x128xf32>
    %cst_48 = arith.constant 1.000000e+00 : f32
    %228 = vector.broadcast %cst_48 : f32 to vector<1x128xf32>
    %229 = arith.addf %228, %227 : vector<1x128xf32>
    %230 = arith.divf %228, %229 : vector<1x128xf32>
    %231 = math.tanh %225 : vector<1x128xf32>
    %232 = vector.extract_strided_slice %230 {offsets = [0, 0], sizes = [1, 32], strides = [1, 1]} : vector<1x128xf32> to vector<1x32xf32>
    %233 = vector.extract_strided_slice %230 {offsets = [0, 32], sizes = [1, 32], strides = [1, 1]} : vector<1x128xf32> to vector<1x32xf32>
    %234 = vector.extract_strided_slice %231 {offsets = [0, 64], sizes = [1, 32], strides = [1, 1]} : vector<1x128xf32> to vector<1x32xf32>
    %235 = vector.extract_strided_slice %230 {offsets = [0, 96], sizes = [1, 32], strides = [1, 1]} : vector<1x128xf32> to vector<1x32xf32>
    %236 = arith.mulf %233, %219 : vector<1x32xf32>
    %237 = arith.mulf %232, %234 : vector<1x32xf32>
    %238 = arith.addf %236, %237 : vector<1x32xf32>
    %239 = math.tanh %238 : vector<1x32xf32>
    %240 = arith.mulf %235, %239 : vector<1x32xf32>
    %241 = vector.extract_strided_slice %181 {offsets = [3, 0], sizes = [1, 128], strides = [1, 1]} : vector<8x128xf32> to vector<1x128xf32>
    %242 = arith.truncf %240 : vector<1x32xf32> to vector<1x32xbf16>
    %cst_49 = arith.constant dense<0.000000e+00> : vector<1x128xf32>
    %243 = tpu.matmul %242, %183, %cst_49 {dimension_numbers = #tpu.dot_dimension_numbers<[1], [0], [0], [1], [0, 0, 1, 1], [], []>} : vector<1x32xbf16>, vector<32x128xbf16>, vector<1x128xf32> -> vector<1x128xf32>
    %244 = arith.addf %241, %243 : vector<1x128xf32>
    %245 = arith.negf %244 : vector<1x128xf32>
    %246 = math.exp %245 : vector<1x128xf32>
    %cst_50 = arith.constant 1.000000e+00 : f32
    %247 = vector.broadcast %cst_50 : f32 to vector<1x128xf32>
    %248 = arith.addf %247, %246 : vector<1x128xf32>
    %249 = arith.divf %247, %248 : vector<1x128xf32>
    %250 = math.tanh %244 : vector<1x128xf32>
    %251 = vector.extract_strided_slice %249 {offsets = [0, 0], sizes = [1, 32], strides = [1, 1]} : vector<1x128xf32> to vector<1x32xf32>
    %252 = vector.extract_strided_slice %249 {offsets = [0, 32], sizes = [1, 32], strides = [1, 1]} : vector<1x128xf32> to vector<1x32xf32>
    %253 = vector.extract_strided_slice %250 {offsets = [0, 64], sizes = [1, 32], strides = [1, 1]} : vector<1x128xf32> to vector<1x32xf32>
    %254 = vector.extract_strided_slice %249 {offsets = [0, 96], sizes = [1, 32], strides = [1, 1]} : vector<1x128xf32> to vector<1x32xf32>
    %255 = arith.mulf %252, %238 : vector<1x32xf32>
    %256 = arith.mulf %251, %253 : vector<1x32xf32>
    %257 = arith.addf %255, %256 : vector<1x32xf32>
    %258 = math.tanh %257 : vector<1x32xf32>
    %259 = arith.mulf %254, %258 : vector<1x32xf32>
    %260 = vector.extract_strided_slice %181 {offsets = [4, 0], sizes = [1, 128], strides = [1, 1]} : vector<8x128xf32> to vector<1x128xf32>
    %261 = arith.truncf %259 : vector<1x32xf32> to vector<1x32xbf16>
    %cst_51 = arith.constant dense<0.000000e+00> : vector<1x128xf32>
    %262 = tpu.matmul %261, %183, %cst_51 {dimension_numbers = #tpu.dot_dimension_numbers<[1], [0], [0], [1], [0, 0, 1, 1], [], []>} : vector<1x32xbf16>, vector<32x128xbf16>, vector<1x128xf32> -> vector<1x128xf32>
    %263 = arith.addf %260, %262 : vector<1x128xf32>
    %264 = arith.negf %263 : vector<1x128xf32>
    %265 = math.exp %264 : vector<1x128xf32>
    %cst_52 = arith.constant 1.000000e+00 : f32
    %266 = vector.broadcast %cst_52 : f32 to vector<1x128xf32>
    %267 = arith.addf %266, %265 : vector<1x128xf32>
    %268 = arith.divf %266, %267 : vector<1x128xf32>
    %269 = math.tanh %263 : vector<1x128xf32>
    %270 = vector.extract_strided_slice %268 {offsets = [0, 0], sizes = [1, 32], strides = [1, 1]} : vector<1x128xf32> to vector<1x32xf32>
    %271 = vector.extract_strided_slice %268 {offsets = [0, 32], sizes = [1, 32], strides = [1, 1]} : vector<1x128xf32> to vector<1x32xf32>
    %272 = vector.extract_strided_slice %269 {offsets = [0, 64], sizes = [1, 32], strides = [1, 1]} : vector<1x128xf32> to vector<1x32xf32>
    %273 = vector.extract_strided_slice %268 {offsets = [0, 96], sizes = [1, 32], strides = [1, 1]} : vector<1x128xf32> to vector<1x32xf32>
    %274 = arith.mulf %271, %257 : vector<1x32xf32>
    %275 = arith.mulf %270, %272 : vector<1x32xf32>
    %276 = arith.addf %274, %275 : vector<1x32xf32>
    %277 = math.tanh %276 : vector<1x32xf32>
    %278 = arith.mulf %273, %277 : vector<1x32xf32>
    %279 = vector.extract_strided_slice %181 {offsets = [5, 0], sizes = [1, 128], strides = [1, 1]} : vector<8x128xf32> to vector<1x128xf32>
    %280 = arith.truncf %278 : vector<1x32xf32> to vector<1x32xbf16>
    %cst_53 = arith.constant dense<0.000000e+00> : vector<1x128xf32>
    %281 = tpu.matmul %280, %183, %cst_53 {dimension_numbers = #tpu.dot_dimension_numbers<[1], [0], [0], [1], [0, 0, 1, 1], [], []>} : vector<1x32xbf16>, vector<32x128xbf16>, vector<1x128xf32> -> vector<1x128xf32>
    %282 = arith.addf %279, %281 : vector<1x128xf32>
    %283 = arith.negf %282 : vector<1x128xf32>
    %284 = math.exp %283 : vector<1x128xf32>
    %cst_54 = arith.constant 1.000000e+00 : f32
    %285 = vector.broadcast %cst_54 : f32 to vector<1x128xf32>
    %286 = arith.addf %285, %284 : vector<1x128xf32>
    %287 = arith.divf %285, %286 : vector<1x128xf32>
    %288 = math.tanh %282 : vector<1x128xf32>
    %289 = vector.extract_strided_slice %287 {offsets = [0, 0], sizes = [1, 32], strides = [1, 1]} : vector<1x128xf32> to vector<1x32xf32>
    %290 = vector.extract_strided_slice %287 {offsets = [0, 32], sizes = [1, 32], strides = [1, 1]} : vector<1x128xf32> to vector<1x32xf32>
    %291 = vector.extract_strided_slice %288 {offsets = [0, 64], sizes = [1, 32], strides = [1, 1]} : vector<1x128xf32> to vector<1x32xf32>
    %292 = vector.extract_strided_slice %287 {offsets = [0, 96], sizes = [1, 32], strides = [1, 1]} : vector<1x128xf32> to vector<1x32xf32>
    %293 = arith.mulf %290, %276 : vector<1x32xf32>
    %294 = arith.mulf %289, %291 : vector<1x32xf32>
    %295 = arith.addf %293, %294 : vector<1x32xf32>
    %296 = math.tanh %295 : vector<1x32xf32>
    %297 = arith.mulf %292, %296 : vector<1x32xf32>
    %298 = vector.extract_strided_slice %181 {offsets = [6, 0], sizes = [1, 128], strides = [1, 1]} : vector<8x128xf32> to vector<1x128xf32>
    %299 = arith.truncf %297 : vector<1x32xf32> to vector<1x32xbf16>
    %cst_55 = arith.constant dense<0.000000e+00> : vector<1x128xf32>
    %300 = tpu.matmul %299, %183, %cst_55 {dimension_numbers = #tpu.dot_dimension_numbers<[1], [0], [0], [1], [0, 0, 1, 1], [], []>} : vector<1x32xbf16>, vector<32x128xbf16>, vector<1x128xf32> -> vector<1x128xf32>
    %301 = arith.addf %298, %300 : vector<1x128xf32>
    %302 = arith.negf %301 : vector<1x128xf32>
    %303 = math.exp %302 : vector<1x128xf32>
    %cst_56 = arith.constant 1.000000e+00 : f32
    %304 = vector.broadcast %cst_56 : f32 to vector<1x128xf32>
    %305 = arith.addf %304, %303 : vector<1x128xf32>
    %306 = arith.divf %304, %305 : vector<1x128xf32>
    %307 = math.tanh %301 : vector<1x128xf32>
    %308 = vector.extract_strided_slice %306 {offsets = [0, 0], sizes = [1, 32], strides = [1, 1]} : vector<1x128xf32> to vector<1x32xf32>
    %309 = vector.extract_strided_slice %306 {offsets = [0, 32], sizes = [1, 32], strides = [1, 1]} : vector<1x128xf32> to vector<1x32xf32>
    %310 = vector.extract_strided_slice %307 {offsets = [0, 64], sizes = [1, 32], strides = [1, 1]} : vector<1x128xf32> to vector<1x32xf32>
    %311 = vector.extract_strided_slice %306 {offsets = [0, 96], sizes = [1, 32], strides = [1, 1]} : vector<1x128xf32> to vector<1x32xf32>
    %312 = arith.mulf %309, %295 : vector<1x32xf32>
    %313 = arith.mulf %308, %310 : vector<1x32xf32>
    %314 = arith.addf %312, %313 : vector<1x32xf32>
    %315 = math.tanh %314 : vector<1x32xf32>
    %316 = arith.mulf %311, %315 : vector<1x32xf32>
    %317 = vector.extract_strided_slice %181 {offsets = [7, 0], sizes = [1, 128], strides = [1, 1]} : vector<8x128xf32> to vector<1x128xf32>
    %318 = arith.truncf %316 : vector<1x32xf32> to vector<1x32xbf16>
    %cst_57 = arith.constant dense<0.000000e+00> : vector<1x128xf32>
    %319 = tpu.matmul %318, %183, %cst_57 {dimension_numbers = #tpu.dot_dimension_numbers<[1], [0], [0], [1], [0, 0, 1, 1], [], []>} : vector<1x32xbf16>, vector<32x128xbf16>, vector<1x128xf32> -> vector<1x128xf32>
    %320 = arith.addf %317, %319 : vector<1x128xf32>
    %321 = arith.negf %320 : vector<1x128xf32>
    %322 = math.exp %321 : vector<1x128xf32>
    %cst_58 = arith.constant 1.000000e+00 : f32
    %323 = vector.broadcast %cst_58 : f32 to vector<1x128xf32>
    %324 = arith.addf %323, %322 : vector<1x128xf32>
    %325 = arith.divf %323, %324 : vector<1x128xf32>
    %326 = math.tanh %320 : vector<1x128xf32>
    %327 = vector.extract_strided_slice %325 {offsets = [0, 0], sizes = [1, 32], strides = [1, 1]} : vector<1x128xf32> to vector<1x32xf32>
    %328 = vector.extract_strided_slice %325 {offsets = [0, 32], sizes = [1, 32], strides = [1, 1]} : vector<1x128xf32> to vector<1x32xf32>
    %329 = vector.extract_strided_slice %326 {offsets = [0, 64], sizes = [1, 32], strides = [1, 1]} : vector<1x128xf32> to vector<1x32xf32>
    %330 = vector.extract_strided_slice %325 {offsets = [0, 96], sizes = [1, 32], strides = [1, 1]} : vector<1x128xf32> to vector<1x32xf32>
    %331 = arith.mulf %328, %314 : vector<1x32xf32>
    %332 = arith.mulf %327, %329 : vector<1x32xf32>
    %333 = arith.addf %331, %332 : vector<1x32xf32>
    %334 = math.tanh %333 : vector<1x32xf32>
    %335 = arith.mulf %330, %334 : vector<1x32xf32>
    %336 = tpu.concatenate %202, %221, %240, %259, %278, %297, %316, %335 in 0 : vector<1x32xf32>, vector<1x32xf32>, vector<1x32xf32>, vector<1x32xf32>, vector<1x32xf32>, vector<1x32xf32>, vector<1x32xf32>, vector<1x32xf32> -> vector<8x32xf32>
    %337 = arith.truncf %336 : vector<8x32xf32> to vector<8x32xbf16>
    %c0_59 = arith.constant 0 : index
    %c0_60 = arith.constant 0 : index
    %338 = vector.load %arg6[%c0_59, %c0_60] : memref<32x128xbf16, #tpu.memory_space<vmem>>, vector<32x128xbf16>
    %cst_61 = arith.constant dense<0.000000e+00> : vector<8x128xf32>
    %339 = tpu.matmul %337, %338, %cst_61 {dimension_numbers = #tpu.dot_dimension_numbers<[1], [0], [0], [1], [0, 0, 1, 1], [], []>} : vector<8x32xbf16>, vector<32x128xbf16>, vector<8x128xf32> -> vector<8x128xf32>
    %c0_62 = arith.constant 0 : index
    %c0_63 = arith.constant 0 : index
    %340 = vector.load %arg7[%c0_62, %c0_63] : memref<1x128xf32, #tpu.memory_space<vmem>>, vector<1x128xf32>
    %341 = vector.broadcast %340 : vector<1x128xf32> to vector<8x128xf32>
    %342 = arith.addf %339, %341 : vector<8x128xf32>
    %343 = arith.negf %342 : vector<8x128xf32>
    %344 = math.exp %343 : vector<8x128xf32>
    %cst_64 = arith.constant 1.000000e+00 : f32
    %345 = vector.broadcast %cst_64 : f32 to vector<8x128xf32>
    %346 = arith.addf %345, %344 : vector<8x128xf32>
    %347 = arith.divf %345, %346 : vector<8x128xf32>
    %c0_65 = arith.constant 0 : index
    %c0_66 = arith.constant 0 : index
    %348 = vector.load %arg8[%c0_65, %c0_66] : memref<8x128xf32, #tpu.memory_space<vmem>>, vector<8x128xf32>
    tpu.vector_store %arg8[%c0_65, %c0_66], %347 {strides = array<i32>} : memref<8x128xf32, #tpu.memory_space<vmem>>, vector<8x128xf32>,
    return
  }
}

</mosaic_0001>

<bundles_post_ra>
// kernel: model_forward.1
= control target key start
LH: loop header
LB: loop body
LE: loop exit
PB: predicated region body
PF: predicated region fallthrough
CT: control target
= control target key end

     0   :  { %13 = vsyncpa [#allocation3], 0  ;;  %s2582_s0 = inlined_call_operand.hbm [shape: f32[8,16], index: 0, kind: input, shape index: {}]   ;;  %s2583_s1 = inlined_call_operand.hbm [shape: bf16[16,32], index: 1, kind: input, shape index: {}]   ;;  %s2584_s2 = inlined_call_operand.vmem [shape: f32[1,32], index: 2, kind: input, shape index: {}]   ;;  %s2585_s3 = inlined_call_operand.hbm [shape: bf16[2,32,128], index: 3, kind: input, shape index: {}]   ;;  %s2586_s4 = inlined_call_operand.hbm [shape: bf16[2,32,128], index: 4, kind: input, shape index: {}]   ;;  %s2587_s5 = inlined_call_operand.vmem [shape: f32[2,1,128], index: 5, kind: input, shape index: {}]   ;;  %s2588_s6 = inlined_call_operand.vmem [shape: bf16[32,128], index: 6, kind: input, shape index: {}]   ;;  %s2589_s7 = inlined_call_operand.vmem [shape: f32[1,128], index: 7, kind: input, shape index: {}]   ;;  %s2590_s8 = inlined_call_operand.vmem [shape: f32[8,128], index: 8, kind: output, shape index: {}]  }
   0x1   :  { %14 = vsyncpa [#allocation5], 0 }
   0x2   :  { %15 = vsyncpa [#allocation8], 0  ;;  %s2199_s27 = smov [#allocation4]   ;;  %s2105_s9 = scalar_lea.hbm %s2583_s1, 128 }
   0x3   :  { %s31_s28 = sshll.u32 %s2199_s27, 4  ;;  %p2106_p0 = scmp.ne.s32.totalorder %s2583_s1, %s2105_s9  ;;  %s32_s28 = int_to_ptr.vmem [resolvable:$true] %s31_s28 }
   0x4   :  { %p2109_p1 = scmp.lt.u32.totalorder %s2105_s9, %s2583_s1 }
   0x6   :  { %p2111_p2 = pnand %p2109_p1, %p2106_p0 }
   0x8   :  { %2114 = shalt.err (!%p2111_p2)
}
   0x9   :  { %s2115_s14 = scalar_lea.vmem %s32_s28, 128  ;;  %p2120_p4 = scmp.lt.s32.totalorder %s32_s28, %s32_s28 }
   0xa   :  { %p2116_p3 = scmp.ne.s32.totalorder %s32_s28, %s2115_s14  ;;  %p2121_p5 = scmp.lt.s32.totalorder %s2115_s14, %s2115_s14 }
   0xc   :  { %p2122_p6 = por %p2121_p5, %p2120_p4 }
   0xe   :  { %p2123_p7 = pnand %p2122_p6, %p2116_p3 }
  0x10   :  { %2126 = shalt.err (!%p2123_p7)
}
  0x11   :  { %s2200_s15 = smov 64   ;;  %s2201_s16 = smov 4  }
  0x12   :  { %37 = dma.hbm_to_vmem [thread:$0]  %s2583_s1, 128, %s32_s28, [#allocation5], %s2200_s15, %s2200_s15, %s2201_s16  }
  0x13   :  { %s2202_s19 = smov [#allocation2]   ;;  %s2203_s21 = smov [#allocation6]  }
  0x14   :  { %s22_s20 = sshll.u32 %s2202_s19, 4  ;;  %s45_s22 = sshll.u32 %s2203_s21, 4  ;;  %s23_s20 = int_to_ptr.vmem [resolvable:$true] %s22_s20  ;;  %s46_s22 = int_to_ptr.vmem [resolvable:$true] %s45_s22 }
  0x15   :  { %s2127_s25 = scalar_lea.hbm %s2582_s0, 128 }
  0x16   :  { %p2128_p8 = scmp.ne.s32.totalorder %s2582_s0, %s2127_s25  ;;  %p2131_p9 = scmp.lt.u32.totalorder %s2127_s25, %s2582_s0 }
  0x18   :  { %p2133_p10 = pnand %p2131_p9, %p2128_p8 }
  0x1a   :  { %2136 = shalt.err (!%p2133_p10)
}
  0x1b   :  { %s2137_s1 = scalar_lea.vmem %s23_s20, 128  ;;  %p2142_p12 = scmp.lt.s32.totalorder %s23_s20, %s23_s20 }
  0x1c   :  { %p2138_p11 = scmp.ne.s32.totalorder %s23_s20, %s2137_s1  ;;  %p2143_p13 = scmp.lt.s32.totalorder %s2137_s1, %s2137_s1 }
  0x1e   :  { %p2144_p0 = por %p2143_p13, %p2142_p12 }
  0x20   :  { %p2145_p1 = pnand %p2144_p0, %p2138_p11 }
  0x22   :  { %2148 = shalt.err (!%p2145_p1)
}
  0x23   :  { %25 = dma.hbm_to_vmem [thread:$0]  %s2582_s0, 128, %s23_s20, [#allocation3]  }
  0x24   :  { %s2149_s12 = scalar_lea.hbm %s2585_s3, 512 }
  0x25   :  { %p2150_p2 = scmp.ne.s32.totalorder %s2585_s3, %s2149_s12  ;;  %p2153_p3 = scmp.lt.u32.totalorder %s2149_s12, %s2585_s3 }
  0x27   :  { %p2155_p4 = pnand %p2153_p3, %p2150_p2 }
  0x29   :  { %2158 = shalt.err (!%p2155_p4)
}
  0x2a   :  { %s2159_s19 = scalar_lea.vmem %s46_s22, 512  ;;  %p2164_p6 = scmp.lt.s32.totalorder %s46_s22, %s46_s22 }
  0x2b   :  { %p2160_p5 = scmp.ne.s32.totalorder %s46_s22, %s2159_s19  ;;  %p2165_p7 = scmp.lt.s32.totalorder %s2159_s19, %s2159_s19 }
  0x2d   :  { %p2166_p8 = por %p2165_p7, %p2164_p6 }
  0x2f   :  { %p2167_p9 = pnand %p2166_p8, %p2160_p5 }
  0x31   :  { %2170 = shalt.err (!%p2167_p9)
}
  0x32   :  { %51 = dma.hbm_to_vmem [thread:$0]  %s2585_s3, 512, %s46_s22, [#allocation5], %s2200_s15, %s2200_s15, %s2201_s16  }
  0x33   :  { %s2204_s21 = smov [#allocation7]   ;;  %s2171_s26 = scalar_lea.hbm %s2586_s4, 512 }
  0x34   :  { %s57_s23 = sshll.u32 %s2204_s21, 4  ;;  %p2172_p10 = scmp.ne.s32.totalorder %s2586_s4, %s2171_s26  ;;  %s58_s23 = int_to_ptr.vmem [resolvable:$true] %s57_s23 }
  0x35   :  { %p2175_p11 = scmp.lt.u32.totalorder %s2171_s26, %s2586_s4 }
  0x37   :  { %p2177_p12 = pnand %p2175_p11, %p2172_p10 }
  0x39   :  { %2180 = shalt.err (!%p2177_p12)
}
  0x3a   :  { %s2181_s28 = scalar_lea.vmem %s58_s23, 512  ;;  %p2186_p0 = scmp.lt.s32.totalorder %s58_s23, %s58_s23 }
  0x3b   :  { %p2182_p13 = scmp.ne.s32.totalorder %s58_s23, %s2181_s28  ;;  %p2187_p1 = scmp.lt.s32.totalorder %s2181_s28, %s2181_s28 }
  0x3d   :  { %p2188_p2 = por %p2187_p1, %p2186_p0 }
  0x3f   :  { %p2189_p3 = pnand %p2188_p2, %p2182_p13 }
  0x41   :  { %2192 = shalt.err (!%p2189_p3)
}
  0x42   :  { %63 = dma.hbm_to_vmem [thread:$0]  %s2586_s4, 512, %s58_s23, [#allocation8], %s2200_s15, %s2200_s15, %s2201_s16  }
  0x43   :  { %2193 = dma.done.wait [#allocation3], 128  }
  0x44   :  { %2194 = vsyncadd [#allocation3], 4294967168 }
  0x45   :  { %2195 = dma.done.wait [#allocation5], 640  }
  0x46   :  { %2196 = vsyncadd [#allocation5], 4294966656 }
  0x47   :  { %2197 = dma.done.wait [#allocation8], 512  }
  0x48   :  { %2198 = vsyncadd [#allocation8], 4294966784  ;;  %v2205_v0 = vmov 0.0   ;;  %vm2206_vm0 = vmmov 0   ;;  %v1962_v1 = vld [vmem:[#allocation4] sm:$0xff]   ;;  %v83_v2 = vld [vmem:[#allocation2] sm:$0xff] }
  0x49   :  { %1794 = vmatprep.subr.bf16.mxu0 %v2205_v0  ;;  %1796 = vmatprep.mubr.msk.bf16.mxu0 %vm2206_vm0, %v2205_v0  ;;  %v84_v3 = vpack.c.bf16 %v83_v2, %v83_v2  ;;  %vm100_vm1 = vcmask 130048   ;;  %v2317_v4 = vld [vmem:[#allocation7] sm:$0xff]   ;;  %v2325_v6 = vld [vmem:[#allocation7 + $0x8] sm:$0xff]   ;;  %v2207_v8 = vmov 0   ;;  %vm169_vm2 = vcmask 261120   ;;  %s2208_s10 = smov 32  }
  0x4a   :  { %1800 = vmatprep.subr.bf16.mxu1 %v2205_v0  ;;  %1804 = vmatprep.mubr.msk.bf16.mxu1 %vm2206_vm0, %v2205_v0  ;;  %v1964_v5 = vld [vmem:[#allocation6] sm:$0xff]   ;;  %v1966_v7 = vld [vmem:[#allocation6 + $0x8] sm:$0xff]   ;;  %vm854_vm3 = vcmask 1040384   ;;  %vm856_vm4 = vcmask 1041408   ;;  %vm858_vm5 = vcmask 1042432   ;;  %vm860_vm6 = vcmask 1043456  }
  0x4b   :  { %1795 = vmatpush3.bf16.msra.mxu0 %v1962_v1  ;;  %1801 = vmatpush3.bf16.msra.mxu1 %v1964_v5  ;;  %v1683_v9 = vld [vmem:[%s2584_s2] ss:$0 sm:$0xff]  ;;  %vm862_vm7 = vcmask 1044480   ;;  %vm864_vm8 = vcmask 1045504   ;;  %vm866_vm9 = vcmask 1046528  }
  0x4c   :  { %1808 = vmatprep.subr.bf16.mxu0 %v2205_v0  ;;  %1802 = vmatprep.subr.bf16.mxu1 %v2205_v0  ;;  %v1686_v21 = vld [vmem:[%s2587_s5] ss:$0 sm:$0xff] }
  0x4e   :  { %1797 = vmatmul.mubr.msk.bf16.vlgmr.msra.gmra.mrb[0].mxu0 %vm100_vm1, %v84_v3 }
  0x4f   :  { %1809 = vmatpush3.bf16.msra.mxu0 %v2317_v4  ;;  %1812 = vmatprep.mubr.msk.bf16.mxu0 %vm2206_vm0, %v2205_v0 }
  0x50   :  { %1810 = vmatprep.subr.bf16.mxu0 %v2205_v0  ;;  %1803 = vmatpush3.bf16.msra.mxu1 %v1966_v7 }
  0x51   :  { %1816 = vmatprep.subr.bf16.mxu1 %v2205_v0 }
  0x53   :  { %1811 = vmatpush3.bf16.msra.mxu0 %v2325_v6 }
  0x54   :  { %1824 = vmatprep.subr.bf16.mxu0 %v2205_v0 }
  0x56   :  { %1813 = vmatmul.mubr.bf16.vlgmr.msra.gmra.mrb[4].mxu0 %v2207_v8 }
  0x57   :  { %1825 = vmatpush3.bf16.msra.mxu0 %v2317_v4  ;;  %1828 = vmatprep.mubr.msk.bf16.mxu0 %vm2206_vm0, %v2205_v0 }
  0x58   :  { %1826 = vmatprep.subr.bf16.mxu0 %v2205_v0 }
  0x5b   :  { %1827 = vmatpush3.bf16.msra.mxu0 %v2325_v6 }
  0x5c   :  { %1840 = vmatprep.subr.bf16.mxu0 %v2205_v0 }
 0x121   :  { %v138_v10 = vpop.f32.mrb[0].mxu0 }
 0x122   :  { %v139_v11 = vadd.f32 %v1683_v9, %v138_v10  ;;  %v1798_v12 = vpop.f32.mrb[1].mxu0 }
 0x123   :  { %v141_v13 = vpop.f32.mrb[2].mxu0 }
 0x124   :  { %v144_v14 = vmax.f32 %v139_v11, 0.0  ;;  %v1799_v15 = vpop.f32.mrb[3].mxu0 }
 0x126   :  { %v145_v16 = vpack.c.bf16 %v144_v14, %v144_v14 }
 0x128   :  { %1805 = vmatmul.mubr.msk.bf16.vlgmr.msra.gmra.mrb[0].mxu1 %vm169_vm2, %v145_v16 }
 0x129   :  { %1817 = vmatpush3.bf16.msra.mxu1 %v2317_v4  ;;  %1820 = vmatprep.mubr.msk.bf16.mxu1 %vm2206_vm0, %v2205_v0  ;;  %v266_v17 = vpop.f32.mrb[4].mxu0 }
 0x12a   :  { %1818 = vmatprep.subr.bf16.mxu1 %v2205_v0  ;;  %v1814_v18 = vpop.f32.mrb[5].mxu0 }
 0x12b   :  { %v269_v19 = vpop.f32.mrb[6].mxu0 }
 0x12c   :  { %v1815_v20 = vpop.f32.mrb[7].mxu0 }
 0x12d   :  { %1819 = vmatpush3.bf16.msra.mxu1 %v2325_v6 }
 0x12e   :  { %1832 = vmatprep.subr.bf16.mxu1 %v2205_v0 }
 0x1fb   :  { %v207_v22 = vpop.f32.mrb[0].mxu1 }
 0x1fc   :  { %v2349_v23 = vadd.f32 %v1686_v21, %v207_v22  ;;  %v1806_v24 = vpop.f32.mrb[1].mxu1 }
 0x1fd   :  { %v210_v25 = vpop.f32.mrb[2].mxu1 }
 0x1fe   :  { %v1807_v26 = vpop.f32.mrb[3].mxu1  ;;  %v272_v27 = vadd.f32 %v266_v17, %v2349_v23 }
 0x200   :  { %1973 = vtanh.f32 %v272_v27  ;;  %v1692_v29 = vmul.f32 -1.442695, %v272_v27 }
 0x202   :  { %1975 = vpow2.f32 %v1692_v29 }
 0x20a   :  { %v1974_v28 = vpop.eup %1973 }
 0x20b   :  { %282 = vrot.lane.b32.xlu0 %v1974_v28, %s2200_s15 }
 0x20c   :  { %v1976_v30 = vpop.eup %1975 }
 0x20d   :  { %v276_v31 = vadd.f32 1.0, %v1976_v30 }
 0x20f   :  { %1977 = vrcp.f32 %v276_v31 }
 0x219   :  { %v1978_v32 = vpop.eup %1977 }
 0x21a   :  { %v280_v35 = vmul.f32 0.0, %v1978_v32 }
 0x27d   :  { %v283_v33 = vpop.permute.xlu0 %282 }
 0x27e   :  { %v285_v34 = vmul.f32 %v1978_v32, %v283_v33 }
 0x280   :  { %287 = vrot.lane.b32.xlu0 %v285_v34, %s2208_s10 }
 0x2f2   :  { %v288_v36 = vpop.permute.xlu0 %287 }
 0x2f3   :  { %v290_v37 = vadd.f32 %v288_v36, %v280_v35 }
 0x2f5   :  { %1979 = vtanh.f32 %v290_v37  ;;  %v356_v56 = vrot.slane %v290_v37, 7 }
 0x2ff   :  { %v1980_v38 = vpop.eup %1979 }
 0x300   :  { %293 = vrot.lane.b32.xlu1 %v1980_v38, %s2200_s15 }
 0x372   :  { %v294_v39 = vpop.permute.xlu1 %293 }
 0x373   :  { %v2355_v40 = vmul.f32 %v1978_v32, %v294_v39 }
 0x375   :  { %v297_v41 = vpack.c.bf16 %v2355_v40, %v2355_v40 }
 0x377   :  { %299 = vrot.lane.b32.xlu1 %v297_v41, %s2208_s10 }
 0x3e9   :  { %v300_v42 = vpop.permute.xlu1 %299 }
 0x3ea   :  { %1821 = vmatmul.mubr.msk.bf16.vlgmr.msra.gmra.mrb[4].mxu1 %vm169_vm2, %v300_v42 }
 0x3eb   :  { %1833 = vmatpush3.bf16.msra.mxu1 %v2317_v4  ;;  %1836 = vmatprep.mubr.msk.bf16.mxu1 %vm2206_vm0, %v2205_v0 }
 0x3ec   :  { %1834 = vmatprep.subr.bf16.mxu1 %v2205_v0 }
 0x3ef   :  { %1835 = vmatpush3.bf16.msra.mxu1 %v2325_v6 }
 0x3f0   :  { %1848 = vmatprep.subr.bf16.mxu1 %v2205_v0 }
 0x4bd   :  { %v338_v43 = vpop.f32.mrb[4].mxu1 }
 0x4be   :  { %v345_v44 = vrot.slane %v338_v43, 7  ;;  %v1822_v45 = vpop.f32.mrb[5].mxu1 }
 0x4bf   :  { %v341_v46 = vpop.f32.mrb[6].mxu1 }
 0x4c0   :  { %v347_v47 = vadd.f32 %v345_v44, %v2349_v23  ;;  %v1823_v48 = vpop.f32.mrb[7].mxu1 }
 0x4c2   :  { %1981 = vtanh.f32 %v347_v47  ;;  %v1694_v50 = vmul.f32 -1.442695, %v347_v47 }
 0x4c4   :  { %1983 = vpow2.f32 %v1694_v50 }
 0x4cc   :  { %v1982_v49 = vpop.eup %1981 }
 0x4cd   :  { %360 = vrot.lane.b32.xlu0 %v1982_v49, %s2200_s15 }
 0x4ce   :  { %v1984_v51 = vpop.eup %1983 }
 0x4cf   :  { %v351_v52 = vadd.f32 1.0, %v1984_v51 }
 0x4d1   :  { %1985 = vrcp.f32 %v351_v52 }
 0x4db   :  { %v1986_v53 = vpop.eup %1985 }
 0x4dc   :  { %v358_v57 = vmul.f32 %v1986_v53, %v356_v56 }
 0x53f   :  { %v361_v54 = vpop.permute.xlu0 %360 }
 0x540   :  { %v363_v55 = vmul.f32 %v1986_v53, %v361_v54 }
 0x542   :  { %365 = vrot.lane.b32.xlu1 %v363_v55, %s2208_s10 }
 0x5b4   :  { %v366_v58 = vpop.permute.xlu1 %365 }
 0x5b5   :  { %v368_v59 = vadd.f32 %v366_v58, %v358_v57 }
 0x5b7   :  { %1987 = vtanh.f32 %v368_v59  ;;  %v436_v18 = vrot.slane %v368_v59, 7 }
 0x5c1   :  { %v1988_v60 = vpop.eup %1987 }
 0x5c2   :  { %371 = vrot.lane.b32.xlu0 %v1988_v60, %s2200_s15 }
 0x634   :  { %v372_v61 = vpop.permute.xlu0 %371 }
 0x635   :  { %v374_v62 = vmul.f32 %v1986_v53, %v372_v61 }
 0x637   :  { %v375_v63 = vpack.c.bf16 %v374_v62, %v374_v62  ;;  %v855_v26 = vsel %vm854_vm3, %v2355_v40, %v374_v62 }
 0x639   :  { %v377_v1 = vshrl.u32 %v375_v63, 16 }
 0x63b   :  { %379 = vrot.lane.b32.xlu1 %v377_v1, %s2208_s10 }
 0x6ad   :  { %v380_v2 = vpop.permute.xlu1 %379 }
 0x6ae   :  { %1829 = vmatmul.mubr.msk.bf16.vlgmr.msra.gmra.mrb[8].mxu0 %vm169_vm2, %v380_v2 }
 0x6af   :  { %1841 = vmatpush3.bf16.msra.mxu0 %v2317_v4  ;;  %1844 = vmatprep.mubr.msk.bf16.mxu0 %vm2206_vm0, %v2205_v0 }
 0x6b0   :  { %1842 = vmatprep.subr.bf16.mxu0 %v2205_v0 }
 0x6b3   :  { %1843 = vmatpush3.bf16.msra.mxu0 %v2325_v6 }
 0x6b4   :  { %1856 = vmatprep.subr.bf16.mxu0 %v2205_v0 }
 0x781   :  { %v418_v3 = vpop.f32.mrb[8].mxu0 }
 0x782   :  { %v425_v5 = vrot.slane %v418_v3, 6  ;;  %v1830_v7 = vpop.f32.mrb[9].mxu0 }
 0x783   :  { %v421_v8 = vpop.f32.mrb[10].mxu0 }
 0x784   :  { %v427_v9 = vadd.f32 %v425_v5, %v2349_v23  ;;  %v1831_v10 = vpop.f32.mrb[11].mxu0 }
 0x786   :  { %1989 = vtanh.f32 %v427_v9  ;;  %v1696_v12 = vmul.f32 -1.442695, %v427_v9 }
 0x788   :  { %1991 = vpow2.f32 %v1696_v12 }
 0x790   :  { %v1990_v11 = vpop.eup %1989 }
 0x791   :  { %440 = vrot.lane.b32.xlu0 %v1990_v11, %s2200_s15 }
 0x792   :  { %v1992_v13 = vpop.eup %1991 }
 0x793   :  { %v431_v14 = vadd.f32 1.0, %v1992_v13 }
 0x795   :  { %1993 = vrcp.f32 %v431_v14 }
 0x79f   :  { %v1994_v15 = vpop.eup %1993 }
 0x7a0   :  { %v438_v19 = vmul.f32 %v1994_v15, %v436_v18 }
 0x803   :  { %v441_v16 = vpop.permute.xlu0 %440 }
 0x804   :  { %v443_v17 = vmul.f32 %v1994_v15, %v441_v16 }
 0x806   :  { %445 = vrot.lane.b32.xlu1 %v443_v17, %s2208_s10 }
 0x878   :  { %v446_v20 = vpop.permute.xlu1 %445 }
 0x879   :  { %v448_v21 = vadd.f32 %v446_v20, %v438_v19 }
 0x87b   :  { %1995 = vtanh.f32 %v448_v21  ;;  %v515_v44 = vrot.slane %v448_v21, 7 }
 0x885   :  { %v1996_v22 = vpop.eup %1995 }
 0x886   :  { %451 = vrot.lane.b32.xlu0 %v1996_v22, %s2200_s15 }
 0x8f8   :  { %v452_v24 = vpop.permute.xlu0 %451 }
 0x8f9   :  { %v454_v25 = vmul.f32 %v1994_v15, %v452_v24 }
 0x8fb   :  { %v455_v27 = vpack.c.bf16 %v454_v25, %v454_v25  ;;  %v857_v28 = vsel %vm856_vm4, %v855_v26, %v454_v25 }
 0x8fd   :  { %v457_v29 = vrot.slane %v455_v27, 1 }
 0x8ff   :  { %458 = vrot.lane.b32.xlu1 %v457_v29, %s2208_s10 }
 0x971   :  { %v459_v30 = vpop.permute.xlu1 %458 }
 0x972   :  { %1837 = vmatmul.mubr.msk.bf16.vlgmr.msra.gmra.mrb[8].mxu1 %vm169_vm2, %v459_v30 }
 0x973   :  { %1849 = vmatpush3.bf16.msra.mxu1 %v2317_v4  ;;  %1852 = vmatprep.mubr.msk.bf16.mxu1 %vm2206_vm0, %v2205_v0 }
 0x974   :  { %1850 = vmatprep.subr.bf16.mxu1 %v2205_v0 }
 0x977   :  { %1851 = vmatpush3.bf16.msra.mxu1 %v2325_v6 }
 0x978   :  { %1864 = vmatprep.subr.bf16.mxu1 %v2205_v0 }
 0xa45   :  { %v497_v31 = vpop.f32.mrb[8].mxu1 }
 0xa46   :  { %v504_v32 = vrot.slane %v497_v31, 5  ;;  %v1838_v33 = vpop.f32.mrb[9].mxu1 }
 0xa47   :  { %v500_v34 = vpop.f32.mrb[10].mxu1 }
 0xa48   :  { %v506_v35 = vadd.f32 %v504_v32, %v2349_v23  ;;  %v1839_v36 = vpop.f32.mrb[11].mxu1 }
 0xa4a   :  { %1997 = vtanh.f32 %v506_v35  ;;  %v1698_v38 = vmul.f32 -1.442695, %v506_v35 }
 0xa4c   :  { %1999 = vpow2.f32 %v1698_v38 }
 0xa54   :  { %v1998_v37 = vpop.eup %1997 }
 0xa55   :  { %519 = vrot.lane.b32.xlu0 %v1998_v37, %s2200_s15 }
 0xa56   :  { %v2000_v39 = vpop.eup %1999 }
 0xa57   :  { %v510_v40 = vadd.f32 1.0, %v2000_v39 }
 0xa59   :  { %2001 = vrcp.f32 %v510_v40 }
 0xa63   :  { %v2002_v41 = vpop.eup %2001 }
 0xa64   :  { %v517_v45 = vmul.f32 %v2002_v41, %v515_v44 }
 0xac7   :  { %v520_v42 = vpop.permute.xlu0 %519 }
 0xac8   :  { %v522_v43 = vmul.f32 %v2002_v41, %v520_v42 }
 0xaca   :  { %524 = vrot.lane.b32.xlu1 %v522_v43, %s2208_s10 }
 0xb3c   :  { %v525_v46 = vpop.permute.xlu1 %524 }
 0xb3d   :  { %v527_v47 = vadd.f32 %v525_v46, %v517_v45 }
 0xb3f   :  { %2003 = vtanh.f32 %v527_v47  ;;  %v596_v8 = vrot.slane %v527_v47, 7 }
 0xb49   :  { %v2004_v48 = vpop.eup %2003 }
 0xb4a   :  { %530 = vrot.lane.b32.xlu0 %v2004_v48, %s2200_s15 }
 0xbbc   :  { %v531_v49 = vpop.permute.xlu0 %530 }
 0xbbd   :  { %v533_v50 = vmul.f32 %v2002_v41, %v531_v49 }
 0xbbf   :  { %v534_v51 = vpack.c.bf16 %v533_v50, %v533_v50  ;;  %v859_v52 = vsel %vm858_vm5, %v857_v28, %v533_v50 }
 0xbc1   :  { %v536_v53 = vshrl.u32 %v534_v51, 16 }
 0xbc3   :  { %v538_v54 = vrot.slane %v536_v53, 1 }
 0xbc5   :  { %539 = vrot.lane.b32.xlu1 %v538_v54, %s2208_s10 }
 0xc37   :  { %v540_v55 = vpop.permute.xlu1 %539 }
 0xc38   :  { %1845 = vmatmul.mubr.msk.bf16.vlgmr.msra.gmra.mrb[12].mxu0 %vm169_vm2, %v540_v55 }
 0xc39   :  { %1857 = vmatpush3.bf16.msra.mxu0 %v2317_v4  ;;  %1860 = vmatprep.mubr.msk.bf16.mxu0 %vm2206_vm0, %v2205_v0 }
 0xc3a   :  { %1858 = vmatprep.subr.bf16.mxu0 %v2205_v0 }
 0xc3d   :  { %1859 = vmatpush3.bf16.msra.mxu0 %v2325_v6 }
 0xc3e   :  { %1872 = vmatprep.subr.bf16.mxu0 %v2205_v0 }
 0xd0b   :  { %v578_v56 = vpop.f32.mrb[12].mxu0 }
 0xd0c   :  { %v585_v57 = vrot.slane %v578_v56, 4  ;;  %v1846_v58 = vpop.f32.mrb[13].mxu0 }
 0xd0d   :  { %v581_v59 = vpop.f32.mrb[14].mxu0 }
 0xd0e   :  { %v587_v60 = vadd.f32 %v585_v57, %v2349_v23  ;;  %v1847_v61 = vpop.f32.mrb[15].mxu0 }
 0xd10   :  { %2005 = vtanh.f32 %v587_v60  ;;  %v1700_v63 = vmul.f32 -1.442695, %v587_v60 }
 0xd12   :  { %2007 = vpow2.f32 %v1700_v63 }
 0xd1a   :  { %v2006_v62 = vpop.eup %2005 }
 0xd1b   :  { %600 = vrot.lane.b32.xlu0 %v2006_v62, %s2200_s15 }
 0xd1c   :  { %v2008_v1 = vpop.eup %2007 }
 0xd1d   :  { %v591_v2 = vadd.f32 1.0, %v2008_v1 }
 0xd1f   :  { %2009 = vrcp.f32 %v591_v2 }
 0xd29   :  { %v2010_v3 = vpop.eup %2009 }
 0xd2a   :  { %v598_v9 = vmul.f32 %v2010_v3, %v596_v8 }
 0xd8d   :  { %v601_v5 = vpop.permute.xlu0 %600 }
 0xd8e   :  { %v603_v7 = vmul.f32 %v2010_v3, %v601_v5 }
 0xd90   :  { %605 = vrot.lane.b32.xlu1 %v603_v7, %s2208_s10 }
 0xe02   :  { %v606_v10 = vpop.permute.xlu1 %605 }
 0xe03   :  { %v608_v11 = vadd.f32 %v606_v10, %v598_v9 }
 0xe05   :  { %2011 = vtanh.f32 %v608_v11  ;;  %v675_v31 = vrot.slane %v608_v11, 7 }
 0xe0f   :  { %v2012_v12 = vpop.eup %2011 }
 0xe10   :  { %611 = vrot.lane.b32.xlu0 %v2012_v12, %s2200_s15 }
 0xe82   :  { %v612_v13 = vpop.permute.xlu0 %611 }
 0xe83   :  { %v614_v14 = vmul.f32 %v2010_v3, %v612_v13 }
 0xe85   :  { %v615_v15 = vpack.c.bf16 %v614_v14, %v614_v14  ;;  %v861_v16 = vsel %vm860_vm6, %v859_v52, %v614_v14 }
 0xe87   :  { %v617_v17 = vrot.slane %v615_v15, 2 }
 0xe89   :  { %618 = vrot.lane.b32.xlu1 %v617_v17, %s2208_s10 }
 0xefb   :  { %v619_v18 = vpop.permute.xlu1 %618 }
 0xefc   :  { %1853 = vmatmul.mubr.msk.bf16.vlgmr.msra.gmra.mrb[12].mxu1 %vm169_vm2, %v619_v18 }
 0xefd   :  { %1865 = vmatpush3.bf16.msra.mxu1 %v2317_v4  ;;  %1868 = vmatprep.mubr.msk.bf16.mxu1 %vm2206_vm0, %v2205_v0 }
 0xefe   :  { %1866 = vmatprep.subr.bf16.mxu1 %v2205_v0 }
 0xf01   :  { %1867 = vmatpush3.bf16.msra.mxu1 %v2325_v6 }
 0xf02   :  { %1880 = vmatprep.subr.bf16.mxu1 %v2205_v0 }
 0xfcf   :  { %v657_v19 = vpop.f32.mrb[12].mxu1 }
 0xfd0   :  { %v664_v20 = vrot.slane %v657_v19, 3  ;;  %v1854_v21 = vpop.f32.mrb[13].mxu1 }
 0xfd1   :  { %v660_v22 = vpop.f32.mrb[14].mxu1 }
 0xfd2   :  { %v666_v24 = vadd.f32 %v664_v20, %v2349_v23  ;;  %v1855_v25 = vpop.f32.mrb[15].mxu1 }
 0xfd3   :  { %v1969_v25 = vld [vmem:[#allocation6 + $0x18] sm:$0xff]  }
 0xfd4   :  { %2013 = vtanh.f32 %v666_v24  ;;  %v1702_v4 = vmul.f32 -1.442695, %v666_v24  ;;  %v2444_v24 = vld [vmem:[#allocation7 + $0x10] sm:$0xff]  }
 0xfd6   :  { %2015 = vpow2.f32 %v1702_v4 }
 0xfde   :  { %v2014_v26 = vpop.eup %2013 }
 0xfdf   :  { %679 = vrot.lane.b32.xlu0 %v2014_v26, %s2200_s15  ;;  %v2447_v26 = vld [vmem:[#allocation7 + $0x18] sm:$0xff]  }
 0xfe0   :  { %v2016_v27 = vpop.eup %2015 }
 0xfe1   :  { %v670_v28 = vadd.f32 1.0, %v2016_v27 }
 0xfe3   :  { %2017 = vrcp.f32 %v670_v28 }
 0xfed   :  { %v2018_v29 = vpop.eup %2017 }
 0xfee   :  { %v677_v32 = vmul.f32 %v2018_v29, %v675_v31 }
0x1051   :  { %v680_v6 = vpop.permute.xlu0 %679 }
0x1052   :  { %v682_v30 = vmul.f32 %v2018_v29, %v680_v6 }
0x1054   :  { %684 = vrot.lane.b32.xlu1 %v682_v30, %s2208_s10 }
0x10c6   :  { %v685_v33 = vpop.permute.xlu1 %684 }
0x10c7   :  { %v687_v34 = vadd.f32 %v685_v33, %v677_v32 }
0x10c9   :  { %2019 = vtanh.f32 %v687_v34  ;;  %v756_v56 = vrot.slane %v687_v34, 7 }
0x10d3   :  { %v2020_v35 = vpop.eup %2019 }
0x10d4   :  { %690 = vrot.lane.b32.xlu0 %v2020_v35, %s2200_s15  ;;  %v1708_v35 = vld [vmem:[%s2587_s5 + $0x1] ss:$0 sm:$0xff] }
0x1146   :  { %v691_v36 = vpop.permute.xlu0 %690 }
0x1147   :  { %v693_v37 = vmul.f32 %v2018_v29, %v691_v36 }
0x1149   :  { %v694_v38 = vpack.c.bf16 %v693_v37, %v693_v37  ;;  %v863_v39 = vsel %vm862_vm7, %v861_v16, %v693_v37 }
0x114b   :  { %v696_v40 = vshrl.u32 %v694_v38, 16 }
0x114d   :  { %v698_v41 = vrot.slane %v696_v40, 2 }
0x114f   :  { %699 = vrot.lane.b32.xlu1 %v698_v41, %s2208_s10 }
0x11c1   :  { %v700_v42 = vpop.permute.xlu1 %699 }
0x11c2   :  { %1861 = vmatmul.mubr.msk.bf16.vlgmr.msra.gmra.mrb[16].mxu0 %vm169_vm2, %v700_v42 }
0x11c3   :  { %1876 = vmatprep.mubr.msk.bf16.mxu0 %vm2206_vm0, %v2205_v0 }
0x1295   :  { %v738_v43 = vpop.f32.mrb[16].mxu0 }
0x1296   :  { %v745_v44 = vrot.slane %v738_v43, 2  ;;  %v1862_v45 = vpop.f32.mrb[17].mxu0 }
0x1297   :  { %v741_v46 = vpop.f32.mrb[18].mxu0 }
0x1298   :  { %v747_v47 = vadd.f32 %v745_v44, %v2349_v23  ;;  %v1863_v48 = vpop.f32.mrb[19].mxu0 }
0x129a   :  { %2021 = vtanh.f32 %v747_v47  ;;  %v1704_v50 = vmul.f32 -1.442695, %v747_v47 }
0x129c   :  { %2023 = vpow2.f32 %v1704_v50 }
0x12a4   :  { %v2022_v49 = vpop.eup %2021 }
0x12a5   :  { %760 = vrot.lane.b32.xlu0 %v2022_v49, %s2200_s15 }
0x12a6   :  { %v2024_v51 = vpop.eup %2023 }
0x12a7   :  { %v751_v52 = vadd.f32 1.0, %v2024_v51 }
0x12a9   :  { %2025 = vrcp.f32 %v751_v52 }
0x12b3   :  { %v2026_v53 = vpop.eup %2025 }
0x12b4   :  { %v758_v57 = vmul.f32 %v2026_v53, %v756_v56 }
0x1317   :  { %v761_v54 = vpop.permute.xlu0 %760 }
0x1318   :  { %v763_v55 = vmul.f32 %v2026_v53, %v761_v54 }
0x131a   :  { %765 = vrot.lane.b32.xlu1 %v763_v55, %s2208_s10 }
0x138c   :  { %v766_v58 = vpop.permute.xlu1 %765 }
0x138d   :  { %v768_v59 = vadd.f32 %v766_v58, %v758_v57 }
0x138f   :  { %2027 = vtanh.f32 %v768_v59  ;;  %v835_v19 = vrot.slane %v768_v59, 7 }
0x1399   :  { %v2028_v60 = vpop.eup %2027 }
0x139a   :  { %771 = vrot.lane.b32.xlu0 %v2028_v60, %s2200_s15 }
0x140c   :  { %v772_v61 = vpop.permute.xlu0 %771 }
0x140d   :  { %v774_v62 = vmul.f32 %v2026_v53, %v772_v61 }
0x140f   :  { %v775_v63 = vpack.c.bf16 %v774_v62, %v774_v62  ;;  %v865_v1 = vsel %vm864_vm8, %v863_v39, %v774_v62 }
0x1411   :  { %v777_v2 = vrot.slane %v775_v63, 3 }
0x1413   :  { %778 = vrot.lane.b32.xlu1 %v777_v2, %s2208_s10 }
0x1485   :  { %v779_v3 = vpop.permute.xlu1 %778 }
0x1486   :  { %1869 = vmatmul.mubr.msk.bf16.vlgmr.msra.gmra.mrb[16].mxu1 %vm169_vm2, %v779_v3 }
0x1487   :  { %1884 = vmatprep.mubr.msk.bf16.mxu1 %vm2206_vm0, %v2205_v0  ;;  %1881 = vmatpush3.bf16.msra.mxu1 %v2444_v24 }
0x1488   :  { %1882 = vmatprep.subr.bf16.mxu1 %v2205_v0 }
0x148b   :  { %1883 = vmatpush3.bf16.msra.mxu1 %v2447_v26 }
0x148c   :  { %1896 = vmatprep.subr.bf16.mxu1 %v2205_v0 }
0x1559   :  { %v817_v5 = vpop.f32.mrb[16].mxu1 }
0x155a   :  { %v824_v7 = vrot.slane %v817_v5, 1  ;;  %v1870_v8 = vpop.f32.mrb[17].mxu1 }
0x155b   :  { %v820_v9 = vpop.f32.mrb[18].mxu1 }
0x155c   :  { %v826_v10 = vadd.f32 %v824_v7, %v2349_v23  ;;  %v1871_v11 = vpop.f32.mrb[19].mxu1  ;;  %v1967_v23 = vld [vmem:[#allocation6 + $0x10] sm:$0xff]  }
0x155d   :  { %1873 = vmatpush3.bf16.msra.mxu0 %v1967_v23 }
0x155e   :  { %2029 = vtanh.f32 %v826_v10  ;;  %v1706_v13 = vmul.f32 -1.442695, %v826_v10  ;;  %1874 = vmatprep.subr.bf16.mxu0 %v2205_v0 }
0x1560   :  { %2031 = vpow2.f32 %v1706_v13 }
0x1561   :  { %1875 = vmatpush3.bf16.msra.mxu0 %v1969_v25 }
0x1562   :  { %1888 = vmatprep.subr.bf16.mxu0 %v2205_v0 }
0x1568   :  { %v2030_v12 = vpop.eup %2029 }
0x1569   :  { %839 = vrot.lane.b32.xlu0 %v2030_v12, %s2200_s15 }
0x156a   :  { %v2032_v14 = vpop.eup %2031 }
0x156b   :  { %v830_v15 = vadd.f32 1.0, %v2032_v14 }
0x156d   :  { %2033 = vrcp.f32 %v830_v15 }
0x1577   :  { %v2034_v16 = vpop.eup %2033 }
0x1578   :  { %v837_v20 = vmul.f32 %v2034_v16, %v835_v19 }
0x15db   :  { %v840_v17 = vpop.permute.xlu0 %839 }
0x15dc   :  { %v842_v18 = vmul.f32 %v2034_v16, %v840_v17 }
0x15de   :  { %844 = vrot.lane.b32.xlu1 %v842_v18, %s2208_s10 }
0x1650   :  { %v845_v21 = vpop.permute.xlu1 %844 }
0x1651   :  { %v2441_v22 = vadd.f32 %v845_v21, %v837_v20 }
0x1653   :  { %2035 = vtanh.f32 %v2441_v22  ;;  %v1016_v53 = vrot.slane %v2441_v22, 7 }
0x165d   :  { %v2036_v4 = vpop.eup %2035 }
0x165e   :  { %850 = vrot.lane.b32.xlu0 %v2036_v4, %s2200_s15 }
0x16d0   :  { %v851_v27 = vpop.permute.xlu0 %850 }
0x16d1   :  { %v853_v28 = vmul.f32 %v2034_v16, %v851_v27 }
0x16d3   :  { %v945_v29 = vpack.c.bf16 %v853_v28, %v853_v28  ;;  %v867_v6 = vsel %vm866_vm9, %v865_v1, %v853_v28 }
0x16d4   :  { %v868_v30 = vpack.c.bf16 %v867_v6, %v867_v6 }
0x16d5   :  { %v947_v31 = vshrl.u32 %v945_v29, 16 }
0x16d6   :  { %883 = vrot.lane.b32.xlu1 %v868_v30, %s2208_s10 }
0x16d7   :  { %v949_v32 = vrot.slane %v947_v31, 3 }
0x16d9   :  { %950 = vrot.lane.b32.xlu0 %v949_v32, %s2208_s10 }
0x1748   :  { %v884_v33 = vpop.permute.xlu1 %883 }
0x1749   :  { %1877 = vmatmul.mubr.msk.bf16.vlgmr.msra.gmra.mrb[20].mxu0 %vm169_vm2, %v884_v33 }
0x174a   :  { %1889 = vmatpush3.bf16.msra.mxu0 %v2444_v24  ;;  %1892 = vmatprep.mubr.msk.bf16.mxu0 %vm2206_vm0, %v2205_v0 }
0x174b   :  { %v951_v34 = vpop.permute.xlu0 %950  ;;  %1890 = vmatprep.subr.bf16.mxu0 %v2205_v0 }
0x174c   :  { %1885 = vmatmul.mubr.msk.bf16.vlgmr.msra.gmra.mrb[20].mxu1 %vm169_vm2, %v951_v34 }
0x174d   :  { %1897 = vmatpush3.bf16.msra.mxu1 %v2444_v24  ;;  %1900 = vmatprep.mubr.msk.bf16.mxu1 %vm2206_vm0, %v2205_v0 }
0x174e   :  { %1891 = vmatpush3.bf16.msra.mxu0 %v2447_v26  ;;  %1898 = vmatprep.subr.bf16.mxu1 %v2205_v0 }
0x174f   :  { %1904 = vmatprep.subr.bf16.mxu0 %v2205_v0 }
0x1751   :  { %1899 = vmatpush3.bf16.msra.mxu1 %v2447_v26 }
0x1752   :  { %1912 = vmatprep.subr.bf16.mxu1 %v2205_v0 }
0x181c   :  { %v934_v36 = vpop.f32.mrb[20].mxu0 }
0x181d   :  { %v2475_v37 = vadd.f32 %v1708_v35, %v934_v36  ;;  %v1878_v38 = vpop.f32.mrb[21].mxu0 }
0x181e   :  { %v937_v39 = vpop.f32.mrb[22].mxu0 }
0x181f   :  { %v1879_v40 = vpop.f32.mrb[23].mxu0  ;;  %v1001_v41 = vpop.f32.mrb[20].mxu1 }
0x1820   :  { %v1007_v42 = vadd.f32 %v1001_v41, %v2475_v37  ;;  %v1886_v43 = vpop.f32.mrb[21].mxu1 }
0x1821   :  { %v1004_v44 = vpop.f32.mrb[22].mxu1 }
0x1822   :  { %2037 = vtanh.f32 %v1007_v42  ;;  %v1887_v45 = vpop.f32.mrb[23].mxu1  ;;  %v1715_v47 = vmul.f32 -1.442695, %v1007_v42 }
0x1824   :  { %2039 = vpow2.f32 %v1715_v47 }
0x182c   :  { %v2038_v46 = vpop.eup %2037 }
0x182d   :  { %1020 = vrot.lane.b32.xlu1 %v2038_v46, %s2200_s15 }
0x182e   :  { %v2040_v48 = vpop.eup %2039 }
0x182f   :  { %v1011_v49 = vadd.f32 1.0, %v2040_v48 }
0x1831   :  { %2041 = vrcp.f32 %v1011_v49 }
0x183b   :  { %v2042_v50 = vpop.eup %2041 }
0x183c   :  { %v1018_v54 = vmul.f32 %v2042_v50, %v1016_v53 }
0x189f   :  { %v1021_v51 = vpop.permute.xlu1 %1020 }
0x18a0   :  { %v1023_v52 = vmul.f32 %v2042_v50, %v1021_v51 }
0x18a2   :  { %1025 = vrot.lane.b32.xlu0 %v1023_v52, %s2208_s10 }
0x1914   :  { %v1026_v55 = vpop.permute.xlu0 %1025 }
0x1915   :  { %v1028_v56 = vadd.f32 %v1026_v55, %v1018_v54 }
0x1917   :  { %2043 = vtanh.f32 %v1028_v56  ;;  %v1094_v14 = vrot.slane %v1028_v56, 7 }
0x1921   :  { %v2044_v57 = vpop.eup %2043 }
0x1922   :  { %1031 = vrot.lane.b32.xlu1 %v2044_v57, %s2200_s15 }
0x1994   :  { %v1032_v58 = vpop.permute.xlu1 %1031 }
0x1995   :  { %v2482_v59 = vmul.f32 %v2042_v50, %v1032_v58 }
0x1997   :  { %v1035_v60 = vpack.c.bf16 %v2482_v59, %v2482_v59 }
0x1999   :  { %1037 = vrot.lane.b32.xlu0 %v1035_v60, %s2208_s10 }
0x1a0b   :  { %v1038_v61 = vpop.permute.xlu0 %1037 }
0x1a0c   :  { %1893 = vmatmul.mubr.msk.bf16.vlgmr.msra.gmra.mrb[24].mxu0 %vm169_vm2, %v1038_v61 }
0x1a0d   :  { %1905 = vmatpush3.bf16.msra.mxu0 %v2444_v24  ;;  %1908 = vmatprep.mubr.msk.bf16.mxu0 %vm2206_vm0, %v2205_v0 }
0x1a0e   :  { %1906 = vmatprep.subr.bf16.mxu0 %v2205_v0 }
0x1a11   :  { %1907 = vmatpush3.bf16.msra.mxu0 %v2447_v26 }
0x1a12   :  { %1920 = vmatprep.subr.bf16.mxu0 %v2205_v0 }
0x1adf   :  { %v1076_v62 = vpop.f32.mrb[24].mxu0 }
0x1ae0   :  { %v1083_v63 = vrot.slane %v1076_v62, 7  ;;  %v1894_v1 = vpop.f32.mrb[25].mxu0 }
0x1ae1   :  { %v1079_v2 = vpop.f32.mrb[26].mxu0 }
0x1ae2   :  { %v1085_v3 = vadd.f32 %v1083_v63, %v2475_v37  ;;  %v1895_v5 = vpop.f32.mrb[27].mxu0 }
0x1ae4   :  { %2045 = vtanh.f32 %v1085_v3  ;;  %v1717_v8 = vmul.f32 -1.442695, %v1085_v3 }
0x1ae6   :  { %2047 = vpow2.f32 %v1717_v8 }
0x1aee   :  { %v2046_v7 = vpop.eup %2045 }
0x1aef   :  { %1098 = vrot.lane.b32.xlu1 %v2046_v7, %s2200_s15 }
0x1af0   :  { %v2048_v9 = vpop.eup %2047 }
0x1af1   :  { %v1089_v10 = vadd.f32 1.0, %v2048_v9 }
0x1af3   :  { %2049 = vrcp.f32 %v1089_v10 }
0x1afd   :  { %v2050_v11 = vpop.eup %2049 }
0x1afe   :  { %v1096_v15 = vmul.f32 %v2050_v11, %v1094_v14 }
0x1b61   :  { %v1099_v12 = vpop.permute.xlu1 %1098 }
0x1b62   :  { %v1101_v13 = vmul.f32 %v2050_v11, %v1099_v12 }
0x1b64   :  { %1103 = vrot.lane.b32.xlu0 %v1101_v13, %s2208_s10 }
0x1bd6   :  { %v1104_v16 = vpop.permute.xlu0 %1103 }
0x1bd7   :  { %v1106_v17 = vadd.f32 %v1104_v16, %v1096_v15 }
0x1bd9   :  { %2051 = vtanh.f32 %v1106_v17  ;;  %v1174_v38 = vrot.slane %v1106_v17, 7 }
0x1be3   :  { %v2052_v18 = vpop.eup %2051 }
0x1be4   :  { %1109 = vrot.lane.b32.xlu1 %v2052_v18, %s2200_s15 }
0x1c56   :  { %v1110_v19 = vpop.permute.xlu1 %1109 }
0x1c57   :  { %v1112_v20 = vmul.f32 %v2050_v11, %v1110_v19 }
0x1c59   :  { %v1113_v21 = vpack.c.bf16 %v1112_v20, %v1112_v20  ;;  %v1592_v45 = vsel %vm854_vm3, %v2482_v59, %v1112_v20 }
0x1c5b   :  { %v1115_v22 = vshrl.u32 %v1113_v21, 16 }
0x1c5d   :  { %1117 = vrot.lane.b32.xlu0 %v1115_v22, %s2208_s10 }
0x1ccf   :  { %v1118_v23 = vpop.permute.xlu0 %1117 }
0x1cd0   :  { %1901 = vmatmul.mubr.msk.bf16.vlgmr.msra.gmra.mrb[24].mxu1 %vm169_vm2, %v1118_v23 }
0x1cd1   :  { %1913 = vmatpush3.bf16.msra.mxu1 %v2444_v24  ;;  %1916 = vmatprep.mubr.msk.bf16.mxu1 %vm2206_vm0, %v2205_v0 }
0x1cd2   :  { %1914 = vmatprep.subr.bf16.mxu1 %v2205_v0 }
0x1cd5   :  { %1915 = vmatpush3.bf16.msra.mxu1 %v2447_v26 }
0x1cd6   :  { %1928 = vmatprep.subr.bf16.mxu1 %v2205_v0 }
0x1da3   :  { %v1156_v25 = vpop.f32.mrb[24].mxu1 }
0x1da4   :  { %v1163_v4 = vrot.slane %v1156_v25, 6  ;;  %v1902_v27 = vpop.f32.mrb[25].mxu1 }
0x1da5   :  { %v1159_v28 = vpop.f32.mrb[26].mxu1 }
0x1da6   :  { %v1165_v29 = vadd.f32 %v1163_v4, %v2475_v37  ;;  %v1903_v6 = vpop.f32.mrb[27].mxu1 }
0x1da8   :  { %2053 = vtanh.f32 %v1165_v29  ;;  %v1719_v31 = vmul.f32 -1.442695, %v1165_v29 }
0x1daa   :  { %2055 = vpow2.f32 %v1719_v31 }
0x1db2   :  { %v2054_v30 = vpop.eup %2053 }
0x1db3   :  { %1178 = vrot.lane.b32.xlu1 %v2054_v30, %s2200_s15 }
0x1db4   :  { %v2056_v32 = vpop.eup %2055 }
0x1db5   :  { %v1169_v33 = vadd.f32 1.0, %v2056_v32 }
0x1db7   :  { %2057 = vrcp.f32 %v1169_v33 }
0x1dc1   :  { %v2058_v34 = vpop.eup %2057 }
0x1dc2   :  { %v1176_v39 = vmul.f32 %v2058_v34, %v1174_v38 }
0x1e25   :  { %v1179_v35 = vpop.permute.xlu1 %1178 }
0x1e26   :  { %v1181_v36 = vmul.f32 %v2058_v34, %v1179_v35 }
0x1e28   :  { %1183 = vrot.lane.b32.xlu0 %v1181_v36, %s2208_s10 }
0x1e9a   :  { %v1184_v40 = vpop.permute.xlu0 %1183 }
0x1e9b   :  { %v1186_v41 = vadd.f32 %v1184_v40, %v1176_v39 }
0x1e9d   :  { %2059 = vtanh.f32 %v1186_v41  ;;  %v1253_v63 = vrot.slane %v1186_v41, 7 }
0x1ea7   :  { %v2060_v42 = vpop.eup %2059 }
0x1ea8   :  { %1189 = vrot.lane.b32.xlu1 %v2060_v42, %s2200_s15 }
0x1f1a   :  { %v1190_v43 = vpop.permute.xlu1 %1189 }
0x1f1b   :  { %v1192_v44 = vmul.f32 %v2058_v34, %v1190_v43 }
0x1f1d   :  { %v1193_v46 = vpack.c.bf16 %v1192_v44, %v1192_v44  ;;  %v1593_v47 = vsel %vm856_vm4, %v1592_v45, %v1192_v44 }
0x1f1f   :  { %v1195_v48 = vrot.slane %v1193_v46, 1 }
0x1f21   :  { %1196 = vrot.lane.b32.xlu0 %v1195_v48, %s2208_s10 }
0x1f93   :  { %v1197_v49 = vpop.permute.xlu0 %1196 }
0x1f94   :  { %1909 = vmatmul.mubr.msk.bf16.vlgmr.msra.gmra.mrb[28].mxu0 %vm169_vm2, %v1197_v49 }
0x1f95   :  { %1921 = vmatpush3.bf16.msra.mxu0 %v2444_v24  ;;  %1924 = vmatprep.mubr.msk.bf16.mxu0 %vm2206_vm0, %v2205_v0 }
0x1f96   :  { %1922 = vmatprep.subr.bf16.mxu0 %v2205_v0 }
0x1f99   :  { %1923 = vmatpush3.bf16.msra.mxu0 %v2447_v26 }
0x1f9a   :  { %1936 = vmatprep.subr.bf16.mxu0 %v2205_v0 }
0x2067   :  { %v1235_v50 = vpop.f32.mrb[28].mxu0 }
0x2068   :  { %v1242_v51 = vrot.slane %v1235_v50, 5  ;;  %v1910_v52 = vpop.f32.mrb[29].mxu0 }
0x2069   :  { %v1238_v53 = vpop.f32.mrb[30].mxu0 }
0x206a   :  { %v1244_v54 = vadd.f32 %v1242_v51, %v2475_v37  ;;  %v1911_v55 = vpop.f32.mrb[31].mxu0 }
0x206c   :  { %2061 = vtanh.f32 %v1244_v54  ;;  %v1721_v57 = vmul.f32 -1.442695, %v1244_v54 }
0x206e   :  { %2063 = vpow2.f32 %v1721_v57 }
0x2076   :  { %v2062_v56 = vpop.eup %2061 }
0x2077   :  { %1257 = vrot.lane.b32.xlu1 %v2062_v56, %s2200_s15 }
0x2078   :  { %v2064_v58 = vpop.eup %2063 }
0x2079   :  { %v1248_v59 = vadd.f32 1.0, %v2064_v58 }
0x207b   :  { %2065 = vrcp.f32 %v1248_v59 }
0x2085   :  { %v2066_v60 = vpop.eup %2065 }
0x2086   :  { %v1255_v1 = vmul.f32 %v2066_v60, %v1253_v63 }
0x20e9   :  { %v1258_v61 = vpop.permute.xlu1 %1257 }
0x20ea   :  { %v1260_v62 = vmul.f32 %v2066_v60, %v1258_v61 }
0x20ec   :  { %1262 = vrot.lane.b32.xlu0 %v1260_v62, %s2208_s10 }
0x215e   :  { %v1263_v2 = vpop.permute.xlu0 %1262 }
0x215f   :  { %v1265_v3 = vadd.f32 %v1263_v2, %v1255_v1 }
0x2161   :  { %2067 = vtanh.f32 %v1265_v3  ;;  %v1334_v28 = vrot.slane %v1265_v3, 7 }
0x216b   :  { %v2068_v5 = vpop.eup %2067 }
0x216c   :  { %1268 = vrot.lane.b32.xlu1 %v2068_v5, %s2200_s15 }
0x21de   :  { %v1269_v7 = vpop.permute.xlu1 %1268 }
0x21df   :  { %v1271_v8 = vmul.f32 %v2066_v60, %v1269_v7 }
0x21e1   :  { %v1272_v9 = vpack.c.bf16 %v1271_v8, %v1271_v8  ;;  %v1594_v10 = vsel %vm858_vm5, %v1593_v47, %v1271_v8 }
0x21e3   :  { %v1274_v11 = vshrl.u32 %v1272_v9, 16 }
0x21e5   :  { %v1276_v12 = vrot.slane %v1274_v11, 1 }
0x21e7   :  { %1277 = vrot.lane.b32.xlu0 %v1276_v12, %s2208_s10 }
0x2259   :  { %v1278_v13 = vpop.permute.xlu0 %1277 }
0x225a   :  { %1917 = vmatmul.mubr.msk.bf16.vlgmr.msra.gmra.mrb[28].mxu1 %vm169_vm2, %v1278_v13 }
0x225b   :  { %1929 = vmatpush3.bf16.msra.mxu1 %v2444_v24  ;;  %1932 = vmatprep.mubr.msk.bf16.mxu1 %vm2206_vm0, %v2205_v0 }
0x225c   :  { %1930 = vmatprep.subr.bf16.mxu1 %v2205_v0 }
0x225f   :  { %1931 = vmatpush3.bf16.msra.mxu1 %v2447_v26 }
0x2260   :  { %1944 = vmatprep.subr.bf16.mxu1 %v2205_v0 }
0x232d   :  { %v1316_v14 = vpop.f32.mrb[28].mxu1 }
0x232e   :  { %v1323_v15 = vrot.slane %v1316_v14, 4  ;;  %v1918_v16 = vpop.f32.mrb[29].mxu1 }
0x232f   :  { %v1319_v17 = vpop.f32.mrb[30].mxu1 }
0x2330   :  { %v1325_v18 = vadd.f32 %v1323_v15, %v2475_v37  ;;  %v1919_v19 = vpop.f32.mrb[31].mxu1 }
0x2332   :  { %2069 = vtanh.f32 %v1325_v18  ;;  %v1723_v21 = vmul.f32 -1.442695, %v1325_v18 }
0x2334   :  { %2071 = vpow2.f32 %v1723_v21 }
0x233c   :  { %v2070_v20 = vpop.eup %2069 }
0x233d   :  { %1338 = vrot.lane.b32.xlu1 %v2070_v20, %s2200_s15 }
0x233e   :  { %v2072_v22 = vpop.eup %2071 }
0x233f   :  { %v1329_v23 = vadd.f32 1.0, %v2072_v22 }
0x2341   :  { %2073 = vrcp.f32 %v1329_v23 }
0x234b   :  { %v2074_v25 = vpop.eup %2073 }
0x234c   :  { %v1336_v29 = vmul.f32 %v2074_v25, %v1334_v28 }
0x23af   :  { %v1339_v4 = vpop.permute.xlu1 %1338 }
0x23b0   :  { %v1341_v27 = vmul.f32 %v2074_v25, %v1339_v4 }
0x23b2   :  { %1343 = vrot.lane.b32.xlu0 %v1341_v27, %s2208_s10 }
0x2424   :  { %v1344_v6 = vpop.permute.xlu0 %1343 }
0x2425   :  { %v1346_v30 = vadd.f32 %v1344_v6, %v1336_v29 }
0x2427   :  { %2075 = vtanh.f32 %v1346_v30 }
0x2431   :  { %v2076_v31 = vpop.eup %2075 }
0x2432   :  { %1349 = vrot.lane.b32.xlu1 %v2076_v31, %s2200_s15 }
0x24a4   :  { %v1350_v32 = vpop.permute.xlu1 %1349 }
0x24a5   :  { %v1352_v33 = vmul.f32 %v2074_v25, %v1350_v32 }
0x24a7   :  { %v1353_v34 = vpack.c.bf16 %v1352_v33, %v1352_v33  ;;  %v1595_v35 = vsel %vm860_vm6, %v1594_v10, %v1352_v33 }
0x24a9   :  { %v1355_v36 = vrot.slane %v1353_v34, 2 }
0x24ab   :  { %1356 = vrot.lane.b32.xlu0 %v1355_v36, %s2208_s10 }
0x251d   :  { %v1357_v38 = vpop.permute.xlu0 %1356 }
0x251e   :  { %1925 = vmatmul.mubr.msk.bf16.vlgmr.msra.gmra.mrb[32].mxu0 %vm169_vm2, %v1357_v38 }
0x251f   :  { %1937 = vmatpush3.bf16.msra.mxu0 %v2444_v24  ;;  %1940 = vmatprep.mubr.msk.bf16.mxu0 %vm2206_vm0, %v2205_v0 }
0x2520   :  { %1938 = vmatprep.subr.bf16.mxu0 %v2205_v0 }
0x2523   :  { %1939 = vmatpush3.bf16.msra.mxu0 %v2447_v26  ;;  %v1413_v26 = vrot.slane %v1346_v30, 7 }
0x25f1   :  { %v1395_v39 = vpop.f32.mrb[32].mxu0 }
0x25f2   :  { %v1402_v40 = vrot.slane %v1395_v39, 3  ;;  %v1926_v41 = vpop.f32.mrb[33].mxu0 }
0x25f3   :  { %v1398_v42 = vpop.f32.mrb[34].mxu0 }
0x25f4   :  { %v1404_v43 = vadd.f32 %v1402_v40, %v2475_v37  ;;  %v1927_v44 = vpop.f32.mrb[35].mxu0 }
0x25f6   :  { %2077 = vtanh.f32 %v1404_v43  ;;  %v1725_v46 = vmul.f32 -1.442695, %v1404_v43  ;;  %v1972_v43 = vld [vmem:[%s2588_s6 + $0x8] sm:$0xff]  }
0x25f8   :  { %2079 = vpow2.f32 %v1725_v46 }
0x2600   :  { %v2078_v45 = vpop.eup %2077 }
0x2601   :  { %1417 = vrot.lane.b32.xlu1 %v2078_v45, %s2200_s15 }
0x2602   :  { %v2080_v24 = vpop.eup %2079 }
0x2603   :  { %v1408_v47 = vadd.f32 1.0, %v2080_v24 }
0x2605   :  { %2081 = vrcp.f32 %v1408_v47 }
0x260f   :  { %v2082_v48 = vpop.eup %2081 }
0x2610   :  { %v1415_v51 = vmul.f32 %v2082_v48, %v1413_v26 }
0x2673   :  { %v1418_v49 = vpop.permute.xlu1 %1417 }
0x2674   :  { %v1420_v50 = vmul.f32 %v2082_v48, %v1418_v49  ;;  %v1730_v49 = vld [vmem:[%s2589_s7] ss:$0 sm:$0xff] }
0x2676   :  { %1422 = vrot.lane.b32.xlu0 %v1420_v50, %s2208_s10 }
0x26e8   :  { %v1423_v52 = vpop.permute.xlu0 %1422 }
0x26e9   :  { %v1425_v53 = vadd.f32 %v1423_v52, %v1415_v51 }
0x26eb   :  { %2083 = vtanh.f32 %v1425_v53  ;;  %v1494_v14 = vrot.slane %v1425_v53, 7 }
0x26f5   :  { %v2084_v54 = vpop.eup %2083 }
0x26f6   :  { %1428 = vrot.lane.b32.xlu1 %v2084_v54, %s2200_s15 }
0x2768   :  { %v1429_v55 = vpop.permute.xlu1 %1428 }
0x2769   :  { %v1431_v56 = vmul.f32 %v2082_v48, %v1429_v55 }
0x276b   :  { %v1432_v57 = vpack.c.bf16 %v1431_v56, %v1431_v56  ;;  %v1596_v58 = vsel %vm862_vm7, %v1595_v35, %v1431_v56 }
0x276d   :  { %v1434_v59 = vshrl.u32 %v1432_v57, 16 }
0x276f   :  { %v1436_v60 = vrot.slane %v1434_v59, 2 }
0x2771   :  { %1437 = vrot.lane.b32.xlu0 %v1436_v60, %s2208_s10 }
0x27e3   :  { %v1438_v61 = vpop.permute.xlu0 %1437 }
0x27e4   :  { %1933 = vmatmul.mubr.msk.bf16.vlgmr.msra.gmra.mrb[32].mxu1 %vm169_vm2, %v1438_v61 }
0x27e5   :  { %1948 = vmatprep.mubr.msk.bf16.mxu1 %vm2206_vm0, %v2205_v0 }
0x28b7   :  { %v1476_v62 = vpop.f32.mrb[32].mxu1 }
0x28b8   :  { %v1483_v63 = vrot.slane %v1476_v62, 2  ;;  %v1934_v1 = vpop.f32.mrb[33].mxu1 }
0x28b9   :  { %v1479_v2 = vpop.f32.mrb[34].mxu1 }
0x28ba   :  { %v1485_v3 = vadd.f32 %v1483_v63, %v2475_v37  ;;  %v1935_v5 = vpop.f32.mrb[35].mxu1 }
0x28bc   :  { %2085 = vtanh.f32 %v1485_v3  ;;  %v1727_v8 = vmul.f32 -1.442695, %v1485_v3 }
0x28be   :  { %2087 = vpow2.f32 %v1727_v8 }
0x28c6   :  { %v2086_v7 = vpop.eup %2085 }
0x28c7   :  { %1498 = vrot.lane.b32.xlu1 %v2086_v7, %s2200_s15 }
0x28c8   :  { %v2088_v9 = vpop.eup %2087 }
0x28c9   :  { %v1489_v10 = vadd.f32 1.0, %v2088_v9 }
0x28cb   :  { %2089 = vrcp.f32 %v1489_v10 }
0x28d5   :  { %v2090_v11 = vpop.eup %2089 }
0x28d6   :  { %v1496_v15 = vmul.f32 %v2090_v11, %v1494_v14 }
0x2939   :  { %v1499_v12 = vpop.permute.xlu1 %1498 }
0x293a   :  { %v1501_v13 = vmul.f32 %v2090_v11, %v1499_v12 }
0x293c   :  { %1503 = vrot.lane.b32.xlu0 %v1501_v13, %s2208_s10 }
0x29ae   :  { %v1504_v16 = vpop.permute.xlu0 %1503 }
0x29af   :  { %v1506_v17 = vadd.f32 %v1504_v16, %v1496_v15 }
0x29b1   :  { %2091 = vtanh.f32 %v1506_v17  ;;  %v1573_v39 = vrot.slane %v1506_v17, 7 }
0x29bb   :  { %v2092_v18 = vpop.eup %2091 }
0x29bc   :  { %1509 = vrot.lane.b32.xlu1 %v2092_v18, %s2200_s15 }
0x2a2e   :  { %v1510_v19 = vpop.permute.xlu1 %1509 }
0x2a2f   :  { %v1512_v20 = vmul.f32 %v2090_v11, %v1510_v19 }
0x2a31   :  { %v1513_v21 = vpack.c.bf16 %v1512_v20, %v1512_v20  ;;  %v1597_v22 = vsel %vm864_vm8, %v1596_v58, %v1512_v20 }
0x2a33   :  { %v1515_v23 = vrot.slane %v1513_v21, 3 }
0x2a35   :  { %1516 = vrot.lane.b32.xlu0 %v1515_v23, %s2208_s10 }
0x2aa7   :  { %v1517_v25 = vpop.permute.xlu0 %1516 }
0x2aa8   :  { %1941 = vmatmul.mubr.msk.bf16.vlgmr.msra.gmra.mrb[36].mxu0 %vm169_vm2, %v1517_v25 }
0x2b7b   :  { %v1555_v4 = vpop.f32.mrb[36].mxu0 }
0x2b7c   :  { %v1562_v27 = vrot.slane %v1555_v4, 1  ;;  %v1942_v28 = vpop.f32.mrb[37].mxu0 }
0x2b7d   :  { %v1558_v29 = vpop.f32.mrb[38].mxu0 }
0x2b7e   :  { %v1564_v6 = vadd.f32 %v1562_v27, %v2475_v37  ;;  %v1943_v30 = vpop.f32.mrb[39].mxu0  ;;  %v1971_v37 = vld [vmem:[%s2588_s6] sm:$0xff]  }
0x2b7f   :  { %1945 = vmatpush3.bf16.msra.mxu1 %v1971_v37 }
0x2b80   :  { %2093 = vtanh.f32 %v1564_v6  ;;  %v1729_v32 = vmul.f32 -1.442695, %v1564_v6  ;;  %1946 = vmatprep.subr.bf16.mxu1 %v2205_v0 }
0x2b82   :  { %2095 = vpow2.f32 %v1729_v32 }
0x2b83   :  { %1947 = vmatpush3.bf16.msra.mxu1 %v1972_v43 }
0x2b8a   :  { %v2094_v31 = vpop.eup %2093 }
0x2b8b   :  { %1577 = vrot.lane.b32.xlu1 %v2094_v31, %s2200_s15 }
0x2b8c   :  { %v2096_v33 = vpop.eup %2095 }
0x2b8d   :  { %v1568_v34 = vadd.f32 1.0, %v2096_v33 }
0x2b8f   :  { %2097 = vrcp.f32 %v1568_v34 }
0x2b99   :  { %v2098_v35 = vpop.eup %2097 }
0x2b9a   :  { %v1575_v40 = vmul.f32 %v2098_v35, %v1573_v39 }
0x2bfd   :  { %v1578_v36 = vpop.permute.xlu1 %1577 }
0x2bfe   :  { %v1580_v38 = vmul.f32 %v2098_v35, %v1578_v36 }
0x2c00   :  { %1582 = vrot.lane.b32.xlu0 %v1580_v38, %s2208_s10 }
0x2c72   :  { %v1583_v41 = vpop.permute.xlu0 %1582 }
0x2c73   :  { %v1585_v42 = vadd.f32 %v1583_v41, %v1575_v40 }
0x2c75   :  { %2099 = vtanh.f32 %v1585_v42 }
0x2c7f   :  { %v2100_v44 = vpop.eup %2099 }
0x2c80   :  { %1588 = vrot.lane.b32.xlu1 %v2100_v44, %s2200_s15 }
0x2cf2   :  { %v1589_v45 = vpop.permute.xlu1 %1588 }
0x2cf3   :  { %v1591_v46 = vmul.f32 %v2098_v35, %v1589_v45 }
0x2cf5   :  { %v1598_v24 = vsel %vm866_vm9, %v1597_v22, %v1591_v46 }
0x2cf6   :  { %v1599_v47 = vpack.c.bf16 %v1598_v24, %v1598_v24 }
0x2cf8   :  { %1612 = vrot.lane.b32.xlu0 %v1599_v47, %s2208_s10 }
0x2d6a   :  { %v1613_v48 = vpop.permute.xlu0 %1612 }
0x2d6b   :  { %1949 = vmatmul.mubr.msk.bf16.vlgmr.msra.gmra.mrb[36].mxu1 %vm169_vm2, %v1613_v48 }
0x2e3e   :  { %v1663_v50 = vpop.f32.mrb[36].mxu1 }
0x2e3f   :  { %v1664_v0 = vadd.f32 %v1730_v49, %v1663_v50  ;;  %v1950_v26 = vpop.f32.mrb[37].mxu1 }
0x2e40   :  { %v1666_v51 = vpop.f32.mrb[38].mxu1 }
0x2e41   :  { %v1734_v52 = vmul.f32 -1.442695, %v1664_v0  ;;  %v1951_v53 = vpop.f32.mrb[39].mxu1 }
0x2e43   :  { %2101 = vpow2.f32 %v1734_v52 }
0x2e4d   :  { %v2102_v54 = vpop.eup %2101 }
0x2e4e   :  { %v1672_v55 = vadd.f32 1.0, %v2102_v54 }
0x2e50   :  { %2103 = vrcp.f32 %v1672_v55 }
0x2e5a   :  { %v2104_v56 = vpop.eup %2103 }
0x2e5b   :  { %1675 = vst [vmem:[%s2590_s8] sm:$0xff] %v2104_v56 }
0x2e5c   :  { %1680 = vsyncpa [#allocation3], 1 }
0x2e5d   :  { %1681 = vsyncpa [#allocation5], 1 }
0x2e5e   :  { %1682 = vsyncpa [#allocation8], 1 }

</bundles_post_ra>
